<compile_context>
chip_gen: v7x
topology: tpu7x:2x2x1
jax: 0.10.0
libtpu: 0.0.40
codegen_flags: <defaults>
</compile_context>

<pallas_src>
import numpy as np

import jax
import jax.numpy as jnp
from jax.experimental import pallas as pl
from jax.experimental.pallas import tpu as pltpu

# Fixed architecture constants (from the nn.Module spec).
KSIZE = 5
C_IN, C1, C2 = 3, 6, 16
H_IN, W_IN = 32, 32
H1C, W1C = 28, 28          # conv1 output spatial
P1H, P1W = 14, 14          # pool1 output spatial
H2C, W2C = 10, 10          # conv2 output spatial
P2H, P2W = 5, 5            # pool2 output spatial
FC1, FC2, NCLS = 120, 84, 10


# ---------------------------------------------------------------------------
# Fused Pallas kernel: whole forward pass for one batch tile.
# ---------------------------------------------------------------------------

def _convnet_kernel(x_ref, a1e_ref, a1o_ref, b1_ref,
                    a2e_ref, a2o_ref, b2_ref,
                    se1_ref, so1_ref, se2_ref, so2_ref, g_ref,
                    w1_ref, bf1_ref, w2_ref, bf2_ref, w3_ref, bf3_ref,
                    o_ref):
    f32 = jnp.float32
    x = x_ref[...]                          # (tb*32, 96): rows=(b,h), lanes=(w,c)
    tb = x.shape[0] // H_IN                 # batch-tile size (static)

    def band_conv_relu_wpool(inp, ae_ref, ao_ref, b_ref, rows_out):
        """conv (valid, stride 1) + bias + ReLU + 2x-maxpool over width.

        inp rows = (image, h), lanes = (w, c_in).  Returns rows_out rows with
        lanes = (pooled_w, c_out).  Rows that straddle image boundaries are
        garbage but finite; they are never selected downstream.
        """
        e = None
        o = None
        for kh in range(KSIZE):
            slab = inp[kh:kh + rows_out, :]
            de = jnp.dot(slab, ae_ref[kh], preferred_element_type=f32)
            do = jnp.dot(slab, ao_ref[kh], preferred_element_type=f32)
            e = de if e is None else e + de
            o = do if o is None else o + do
        bias = b_ref[...]
        e = jnp.maximum(e + bias, 0.0)
        o = jnp.maximum(o + bias, 0.0)
        return jnp.maximum(e, o)

    # --- conv1 + relu + pool1 ------------------------------------------------
    r1 = tb * H_IN - (KSIZE - 1)
    pw1 = band_conv_relu_wpool(x, a1e_ref, a1o_ref, b1_ref, r1)   # (r1, 14*6)
    ph1 = jnp.maximum(
        jnp.dot(se1_ref[...], pw1, preferred_element_type=f32),
        jnp.dot(so1_ref[...], pw1, preferred_element_type=f32))   # (tb*14, 84)

    # --- conv2 + relu + pool2 ------------------------------------------------
    r2 = tb * P1H - (KSIZE - 1)
    pw2 = band_conv_relu_wpool(ph1, a2e_ref, a2o_ref, b2_ref, r2)  # (r2, 5*16)
    ph2 = jnp.maximum(
        jnp.dot(se2_ref[...], pw2, preferred_element_type=f32),
        jnp.dot(so2_ref[...], pw2, preferred_element_type=f32))   # (tb*5, 80)

    # --- flatten (b, h, w, c) -> (b, 400) without reshapes -------------------
    # Gather the 5 per-image rows and concatenate along lanes; the matching
    # (h, w, c) ordering is baked into the prepared fc1 weight.
    if tb == 1:
        qs = [ph2[h:h + 1, :] for h in range(P2H)]
    else:
        qs = [jnp.dot(g_ref[h], ph2, preferred_element_type=f32)
              for h in range(P2H)]
    q = jnp.concatenate(qs, axis=1)                                # (tb, 400)

    # --- fc head + log_softmax ----------------------------------------------
    h1 = jnp.maximum(
        jnp.dot(q, w1_ref[...], preferred_element_type=f32) + bf1_ref[...], 0.0)
    h2 = jnp.maximum(
        jnp.dot(h1, w2_ref[...], preferred_element_type=f32) + bf2_ref[...], 0.0)
    logits = jnp.dot(h2, w3_ref[...], preferred_element_type=f32) + bf3_ref[...]

    m = jnp.max(logits, axis=-1, keepdims=True)
    ex = jnp.exp(logits - m)
    lse = jnp.log(jnp.sum(ex, axis=-1, keepdims=True))
    o_ref[0] = logits - m - lse                                    # (tb, 10)


# ---------------------------------------------------------------------------
# Host-side (one-time) parameter preparation.
# ---------------------------------------------------------------------------

def _band_matrices(w, w_in, out_half):
    """Lower a (C_out, C_in, K, K) conv weight into per-kh band matrices.

    Returns (even, odd), each of shape (K, w_in*C_in, out_half*C_out), mapping
    one input row laid out as (w, c_in) (c fastest) to the conv outputs at
    columns ow = 2*j (even) / 2*j+1 (odd), laid out as (j, c_out).
    """
    c_out, c_in, _, _ = w.shape
    mats = []
    for parity in (0, 1):
        a = np.zeros((KSIZE, w_in * c_in, out_half * c_out), np.float32)
        for kh in range(KSIZE):
            for j in range(out_half):
                ow = 2 * j + parity
                for kw in range(KSIZE):
                    wc = ow + kw
                    a[kh,
                      wc * c_in:(wc + 1) * c_in,
                      j * c_out:(j + 1) * c_out] = w[:, :, kh, kw].T
        mats.append(a)
    return mats


def _selection_matrices(tb):
    """0/1 matrices for the height half of the pools and the fc1 row gather."""
    r1 = tb * H_IN - (KSIZE - 1)
    r2 = tb * P1H - (KSIZE - 1)
    se1 = np.zeros((tb * P1H, r1), np.float32)
    so1 = np.zeros((tb * P1H, r1), np.float32)
    for b in range(tb):
        for i in range(P1H):
            se1[b * P1H + i, b * H_IN + 2 * i] = 1.0
            so1[b * P1H + i, b * H_IN + 2 * i + 1] = 1.0
    se2 = np.zeros((tb * P2H, r2), np.float32)
    so2 = np.zeros((tb * P2H, r2), np.float32)
    for b in range(tb):
        for h in range(P2H):
            se2[b * P2H + h, b * P1H + 2 * h] = 1.0
            so2[b * P2H + h, b * P1H + 2 * h + 1] = 1.0
    gall = np.zeros((P2H, tb, tb * P2H), np.float32)
    for h in range(P2H):
        for b in range(tb):
            gall[h, b, b * P2H + h] = 1.0
    return se1, so1, se2, so2, gall


def init_params(key):
    """Deterministic init matching the nn.Module shapes (U(+-1/sqrt(fan_in)))."""
    def uni(k, shape, fan_in):
        bound = 1.0 / float(fan_in) ** 0.5
        return jax.random.uniform(k, shape, jnp.float32, -bound, bound)

    ks = jax.random.split(key, 10)
    return {
        "conv1_w": uni(ks[0], (C1, C_IN, KSIZE, KSIZE), C_IN * 25),
        "conv1_b": uni(ks[1], (C1,), C_IN * 25),
        "conv2_w": uni(ks[2], (C2, C1, KSIZE, KSIZE), C1 * 25),
        "conv2_b": uni(ks[3], (C2,), C1 * 25),
        "fc1_w": uni(ks[4], (FC1, C2 * P2H * P2W), C2 * P2H * P2W),
        "fc1_b": uni(ks[5], (FC1,), C2 * P2H * P2W),
        "fc2_w": uni(ks[6], (FC2, FC1), FC1),
        "fc2_b": uni(ks[7], (FC2,), FC1),
        "fc3_w": uni(ks[8], (NCLS, FC2), FC2),
        "fc3_b": uni(ks[9], (NCLS,), FC2),
    }


def prepare_params(params):
    """One-time prep: band matrices, pool-folded biases, transposed fc weights.

    fc1's weight columns are permuted from torch's (C, H, W) flatten order to
    this kernel's (H, W, C) order, so no runtime transpose is needed.
    """
    w1 = np.asarray(params["conv1_w"], np.float32)
    w2 = np.asarray(params["conv2_w"], np.float32)
    a1e, a1o = _band_matrices(w1, W_IN, P1W)
    a2e, a2o = _band_matrices(w2, P1W, P2W)

    fc1_w = np.asarray(params["fc1_w"], np.float32)
    w_fc1 = fc1_w.reshape(FC1, C2, P2H, P2W).transpose(2, 3, 1, 0).reshape(
        P2H * P2W * C2, FC1)

    prep = {
        "a1e": a1e, "a1o": a1o,
        "b1": np.tile(np.asarray(params["conv1_b"], np.float32), P1W)[None, :],
        "a2e": a2e, "a2o": a2o,
        "b2": np.tile(np.asarray(params["conv2_b"], np.float32), P2W)[None, :],
        "w_fc1": w_fc1,
        "b_fc1": np.asarray(params["fc1_b"], np.float32)[None, :],
        "w_fc2": np.asarray(params["fc2_w"], np.float32).T.copy(),
        "b_fc2": np.asarray(params["fc2_b"], np.float32)[None, :],
        "w_fc3": np.asarray(params["fc3_w"], np.float32).T.copy(),
        "b_fc3": np.asarray(params["fc3_b"], np.float32)[None, :],
    }
    return {k: jnp.asarray(v) for k, v in prep.items()}


# ---------------------------------------------------------------------------
# Forward pass wrapper.
# ---------------------------------------------------------------------------

def _full_spec(arr):
    n = arr.ndim
    return pl.BlockSpec(tuple(arr.shape), lambda i, n=n: (0,) * n)


def convnet_forward(prep, x, *, batch_tile=8):
    """x: (B, 3, 32, 32) NCHW (like torch) -> (B, 10) f32 log-probabilities."""
    B = x.shape[0]
    assert x.shape[1:] == (C_IN, H_IN, W_IN)

    # Keep >= 2 grid steps whenever B >= 2 so both v7x TensorCores are used.
    tb = max(1, min(batch_tile, B // 2)) if B >= 2 else 1
    g = -(-B // tb)
    bp = g * tb

    # NCHW -> rows=(image, h), lanes=(w, c) layout (tiny one-off XLA op).
    x2 = jnp.transpose(x.astype(jnp.float32), (0, 2, 3, 1))
    x2 = x2.reshape(B * H_IN, W_IN * C_IN)
    if bp > B:
        x2 = jnp.pad(x2, ((0, (bp - B) * H_IN), (0, 0)))

    se1, so1, se2, so2, gall = _selection_matrices(tb)

    consts = (prep["a1e"], prep["a1o"], prep["b1"],
              prep["a2e"], prep["a2o"], prep["b2"],
              se1, so1, se2, so2, gall,
              prep["w_fc1"], prep["b_fc1"],
              prep["w_fc2"], prep["b_fc2"],
              prep["w_fc3"], prep["b_fc3"])

    # Advisory cost estimate (matmul flops dominate; all small).
    r1 = tb * H_IN - (KSIZE - 1)
    r2 = tb * P1H - (KSIZE - 1)
    flops_step = (
        2 * r1 * (W_IN * C_IN) * (P1W * C1) * (2 * KSIZE)
        + 2 * (tb * P1H) * r1 * (P1W * C1) * 2
        + 2 * r2 * (P1W * C1) * (P2W * C2) * (2 * KSIZE)
        + 2 * (tb * P2H) * r2 * (P2W * C2) * 2
        + 2 * tb * (tb * P2H) * (P2W * C2) * P2H
        + 2 * tb * (P2H * P2W * C2) * FC1
        + 2 * tb * FC1 * FC2 + 2 * tb * FC2 * NCLS)
    bytes_consts = sum(int(c.size) * 4 for c in consts)
    cost = pl.CostEstimate(
        flops=int(g * flops_step),
        transcendentals=int(g * tb * (NCLS + 1)),
        bytes_accessed=int(x2.size * 4 + bytes_consts + bp * NCLS * 4))

    out = pl.pallas_call(
        _convnet_kernel,
        out_shape=jax.ShapeDtypeStruct((g, tb, NCLS), jnp.float32),
        grid=(g,),
        in_specs=[pl.BlockSpec((tb * H_IN, W_IN * C_IN), lambda i: (i, 0))]
                 + [_full_spec(c) for c in consts],
        out_specs=pl.BlockSpec((1, tb, NCLS), lambda i: (i, 0, 0)),
        compiler_params=pltpu.CompilerParams(
            dimension_semantics=("parallel",)),
        cost_estimate=cost,
    )(x2, *consts)

    return out.reshape(bp, NCLS)[:B]


# ---------------------------------------------------------------------------
# Pure-JAX reference (for the correctness self-check only).
# ---------------------------------------------------------------------------

def reference_forward(params, x):
    hp = jax.lax.Precision.HIGHEST

    def conv(y, w, b):
        dn = jax.lax.conv_dimension_numbers(y.shape, w.shape,
                                            ("NCHW", "OIHW", "NCHW"))
        y = jax.lax.conv_general_dilated(y, w, (1, 1), "VALID",
                                         dimension_numbers=dn, precision=hp)
        return jax.nn.relu(y + b[None, :, None, None])

    def pool(y):
        return jax.lax.reduce_window(y, -jnp.inf, jax.lax.max,
                                     (1, 1, 2, 2), (1, 1, 2, 2), "VALID")

    y = pool(conv(x, params["conv1_w"], params["conv1_b"]))
    y = pool(conv(y, params["conv2_w"], params["conv2_b"]))
    y = y.reshape(y.shape[0], -1)
    y = jax.nn.relu(jnp.dot(y, params["fc1_w"].T, precision=hp)
                    + params["fc1_b"])
    y = jax.nn.relu(jnp.dot(y, params["fc2_w"].T, precision=hp)
                    + params["fc2_b"])
    y = jnp.dot(y, params["fc3_w"].T, precision=hp) + params["fc3_b"]
    return jax.nn.log_softmax(y, axis=1)


# ---------------------------------------------------------------------------

if __name__ == "__main__":
    key = jax.random.PRNGKey(0)
    pkey, xkey = jax.random.split(key)
    params = init_params(pkey)
    prep = prepare_params(params)

    # fc1 expects 16*5*5 features, which forces 32x32 spatial input.
    x = jax.random.normal(xkey, (2, C_IN, H_IN, W_IN), jnp.float32)

    fwd = jax.jit(convnet_forward)
    out = jax.block_until_ready(fwd(prep, x))

    assert out.shape == (2, NCLS)
    assert bool(jnp.all(jnp.isfinite(out)))
    # log_softmax rows should sum to ~1 in probability space.
    assert bool(jnp.allclose(jnp.sum(jnp.exp(out), axis=1), 1.0, atol=1e-3))

    # Check against a plain-JAX reference of the torch module.
    ref = reference_forward(params, x)
    np.testing.assert_allclose(np.asarray(out), np.asarray(ref),
                               atol=5e-2, rtol=5e-2)

    print("KERNEL_OK")
</pallas_src>

<mosaic_0001>
module attributes {stable_mosaic.version = 11 : i64} {
  func.func @_convnet_kernel(%arg0: i32, %arg1: memref<32x96xf32, #tpu.memory_space<vmem>>, %arg2: memref<5x96x84xf32, #tpu.memory_space<vmem>>, %arg3: memref<5x96x84xf32, #tpu.memory_space<vmem>>, %arg4: memref<1x84xf32, #tpu.memory_space<vmem>>, %arg5: memref<5x84x80xf32, #tpu.memory_space<vmem>>, %arg6: memref<5x84x80xf32, #tpu.memory_space<vmem>>, %arg7: memref<1x80xf32, #tpu.memory_space<vmem>>, %arg8: memref<14x28xf32, #tpu.memory_space<vmem>>, %arg9: memref<14x28xf32, #tpu.memory_space<vmem>>, %arg10: memref<5x10xf32, #tpu.memory_space<vmem>>, %arg11: memref<5x10xf32, #tpu.memory_space<vmem>>, %arg12: memref<5x1x5xf32, #tpu.memory_space<vmem>>, %arg13: memref<400x120xf32, #tpu.memory_space<vmem>>, %arg14: memref<1x120xf32, #tpu.memory_space<vmem>>, %arg15: memref<120x84xf32, #tpu.memory_space<vmem>>, %arg16: memref<1x84xf32, #tpu.memory_space<vmem>>, %arg17: memref<84x10xf32, #tpu.memory_space<vmem>>, %arg18: memref<1x10xf32, #tpu.memory_space<vmem>>, %arg19: memref<1x1x10xf32, #tpu.memory_space<vmem>>) attributes {dimension_semantics = [#tpu.dimension_semantics<parallel>], iteration_bounds = array<i64: 2>, scalar_prefetch = 0 : i64, scratch_operands = 0 : i64, tpu.core_type = #tpu.core_type<tc>, window_params = [{transform_indices = @transform_0, window_bounds = array<i64: 32, 96>}, {pipeline_mode = #tpu.pipeline_mode<synchronous>, transform_indices = @transform_1, window_bounds = array<i64: 5, 96, 84>}, {pipeline_mode = #tpu.pipeline_mode<synchronous>, transform_indices = @transform_2, window_bounds = array<i64: 5, 96, 84>}, {pipeline_mode = #tpu.pipeline_mode<synchronous>, transform_indices = @transform_3, window_bounds = array<i64: 1, 84>}, {pipeline_mode = #tpu.pipeline_mode<synchronous>, transform_indices = @transform_4, window_bounds = array<i64: 5, 84, 80>}, {pipeline_mode = #tpu.pipeline_mode<synchronous>, transform_indices = @transform_5, window_bounds = array<i64: 5, 84, 80>}, {pipeline_mode = #tpu.pipeline_mode<synchronous>, transform_indices = @transform_6, window_bounds = array<i64: 1, 80>}, {pipeline_mode = #tpu.pipeline_mode<synchronous>, transform_indices = @transform_7, window_bounds = array<i64: 14, 28>}, {pipeline_mode = #tpu.pipeline_mode<synchronous>, transform_indices = @transform_8, window_bounds = array<i64: 14, 28>}, {pipeline_mode = #tpu.pipeline_mode<synchronous>, transform_indices = @transform_9, window_bounds = array<i64: 5, 10>}, {pipeline_mode = #tpu.pipeline_mode<synchronous>, transform_indices = @transform_10, window_bounds = array<i64: 5, 10>}, {pipeline_mode = #tpu.pipeline_mode<synchronous>, transform_indices = @transform_11, window_bounds = array<i64: 5, 1, 5>}, {pipeline_mode = #tpu.pipeline_mode<synchronous>, transform_indices = @transform_12, window_bounds = array<i64: 400, 120>}, {pipeline_mode = #tpu.pipeline_mode<synchronous>, transform_indices = @transform_13, window_bounds = array<i64: 1, 120>}, {pipeline_mode = #tpu.pipeline_mode<synchronous>, transform_indices = @transform_14, window_bounds = array<i64: 120, 84>}, {pipeline_mode = #tpu.pipeline_mode<synchronous>, transform_indices = @transform_15, window_bounds = array<i64: 1, 84>}, {pipeline_mode = #tpu.pipeline_mode<synchronous>, transform_indices = @transform_16, window_bounds = array<i64: 84, 10>}, {pipeline_mode = #tpu.pipeline_mode<synchronous>, transform_indices = @transform_17, window_bounds = array<i64: 1, 10>}, {transform_indices = @transform_18, window_bounds = array<i64: 1, 1, 10>}]} {
    %c0 = arith.constant 0 : index
    %c0_0 = arith.constant 0 : index
    %0 = vector.load %arg1[%c0, %c0_0] : memref<32x96xf32, #tpu.memory_space<vmem>>, vector<32x96xf32>
    %1 = vector.extract_strided_slice %0 {offsets = [0, 0], sizes = [28, 96], strides = [1, 1]} : vector<32x96xf32> to vector<28x96xf32>
    %c0_1 = arith.constant 0 : index
    %c0_2 = arith.constant 0 : index
    %c0_3 = arith.constant 0 : index
    %2 = vector.load %arg2[%c0_1, %c0_2, %c0_3] : memref<5x96x84xf32, #tpu.memory_space<vmem>>, vector<1x96x84xf32>
    %3 = vector.shape_cast %2 : vector<1x96x84xf32> to vector<96x84xf32>
    %cst = arith.constant dense<0.000000e+00> : vector<28x84xf32>
    %4 = tpu.matmul %1, %3, %cst {dimension_numbers = #tpu.dot_dimension_numbers<[1], [0], [0], [1], [0, 0, 1, 1], [], []>} : vector<28x96xf32>, vector<96x84xf32>, vector<28x84xf32> -> vector<28x84xf32>
    %c0_4 = arith.constant 0 : index
    %c0_5 = arith.constant 0 : index
    %c0_6 = arith.constant 0 : index
    %5 = vector.load %arg3[%c0_4, %c0_5, %c0_6] : memref<5x96x84xf32, #tpu.memory_space<vmem>>, vector<1x96x84xf32>
    %6 = vector.shape_cast %5 : vector<1x96x84xf32> to vector<96x84xf32>
    %cst_7 = arith.constant dense<0.000000e+00> : vector<28x84xf32>
    %7 = tpu.matmul %1, %6, %cst_7 {dimension_numbers = #tpu.dot_dimension_numbers<[1], [0], [0], [1], [0, 0, 1, 1], [], []>} : vector<28x96xf32>, vector<96x84xf32>, vector<28x84xf32> -> vector<28x84xf32>
    %8 = vector.extract_strided_slice %0 {offsets = [1, 0], sizes = [28, 96], strides = [1, 1]} : vector<32x96xf32> to vector<28x96xf32>
    %c1 = arith.constant 1 : index
    %c0_8 = arith.constant 0 : index
    %c0_9 = arith.constant 0 : index
    %9 = vector.load %arg2[%c1, %c0_8, %c0_9] : memref<5x96x84xf32, #tpu.memory_space<vmem>>, vector<1x96x84xf32>
    %10 = vector.shape_cast %9 : vector<1x96x84xf32> to vector<96x84xf32>
    %cst_10 = arith.constant dense<0.000000e+00> : vector<28x84xf32>
    %11 = tpu.matmul %8, %10, %cst_10 {dimension_numbers = #tpu.dot_dimension_numbers<[1], [0], [0], [1], [0, 0, 1, 1], [], []>} : vector<28x96xf32>, vector<96x84xf32>, vector<28x84xf32> -> vector<28x84xf32>
    %c1_11 = arith.constant 1 : index
    %c0_12 = arith.constant 0 : index
    %c0_13 = arith.constant 0 : index
    %12 = vector.load %arg3[%c1_11, %c0_12, %c0_13] : memref<5x96x84xf32, #tpu.memory_space<vmem>>, vector<1x96x84xf32>
    %13 = vector.shape_cast %12 : vector<1x96x84xf32> to vector<96x84xf32>
    %cst_14 = arith.constant dense<0.000000e+00> : vector<28x84xf32>
    %14 = tpu.matmul %8, %13, %cst_14 {dimension_numbers = #tpu.dot_dimension_numbers<[1], [0], [0], [1], [0, 0, 1, 1], [], []>} : vector<28x96xf32>, vector<96x84xf32>, vector<28x84xf32> -> vector<28x84xf32>
    %15 = arith.addf %4, %11 : vector<28x84xf32>
    %16 = arith.addf %7, %14 : vector<28x84xf32>
    %17 = vector.extract_strided_slice %0 {offsets = [2, 0], sizes = [28, 96], strides = [1, 1]} : vector<32x96xf32> to vector<28x96xf32>
    %c2 = arith.constant 2 : index
    %c0_15 = arith.constant 0 : index
    %c0_16 = arith.constant 0 : index
    %18 = vector.load %arg2[%c2, %c0_15, %c0_16] : memref<5x96x84xf32, #tpu.memory_space<vmem>>, vector<1x96x84xf32>
    %19 = vector.shape_cast %18 : vector<1x96x84xf32> to vector<96x84xf32>
    %cst_17 = arith.constant dense<0.000000e+00> : vector<28x84xf32>
    %20 = tpu.matmul %17, %19, %cst_17 {dimension_numbers = #tpu.dot_dimension_numbers<[1], [0], [0], [1], [0, 0, 1, 1], [], []>} : vector<28x96xf32>, vector<96x84xf32>, vector<28x84xf32> -> vector<28x84xf32>
    %c2_18 = arith.constant 2 : index
    %c0_19 = arith.constant 0 : index
    %c0_20 = arith.constant 0 : index
    %21 = vector.load %arg3[%c2_18, %c0_19, %c0_20] : memref<5x96x84xf32, #tpu.memory_space<vmem>>, vector<1x96x84xf32>
    %22 = vector.shape_cast %21 : vector<1x96x84xf32> to vector<96x84xf32>
    %cst_21 = arith.constant dense<0.000000e+00> : vector<28x84xf32>
    %23 = tpu.matmul %17, %22, %cst_21 {dimension_numbers = #tpu.dot_dimension_numbers<[1], [0], [0], [1], [0, 0, 1, 1], [], []>} : vector<28x96xf32>, vector<96x84xf32>, vector<28x84xf32> -> vector<28x84xf32>
    %24 = arith.addf %15, %20 : vector<28x84xf32>
    %25 = arith.addf %16, %23 : vector<28x84xf32>
    %26 = vector.extract_strided_slice %0 {offsets = [3, 0], sizes = [28, 96], strides = [1, 1]} : vector<32x96xf32> to vector<28x96xf32>
    %c3 = arith.constant 3 : index
    %c0_22 = arith.constant 0 : index
    %c0_23 = arith.constant 0 : index
    %27 = vector.load %arg2[%c3, %c0_22, %c0_23] : memref<5x96x84xf32, #tpu.memory_space<vmem>>, vector<1x96x84xf32>
    %28 = vector.shape_cast %27 : vector<1x96x84xf32> to vector<96x84xf32>
    %cst_24 = arith.constant dense<0.000000e+00> : vector<28x84xf32>
    %29 = tpu.matmul %26, %28, %cst_24 {dimension_numbers = #tpu.dot_dimension_numbers<[1], [0], [0], [1], [0, 0, 1, 1], [], []>} : vector<28x96xf32>, vector<96x84xf32>, vector<28x84xf32> -> vector<28x84xf32>
    %c3_25 = arith.constant 3 : index
    %c0_26 = arith.constant 0 : index
    %c0_27 = arith.constant 0 : index
    %30 = vector.load %arg3[%c3_25, %c0_26, %c0_27] : memref<5x96x84xf32, #tpu.memory_space<vmem>>, vector<1x96x84xf32>
    %31 = vector.shape_cast %30 : vector<1x96x84xf32> to vector<96x84xf32>
    %cst_28 = arith.constant dense<0.000000e+00> : vector<28x84xf32>
    %32 = tpu.matmul %26, %31, %cst_28 {dimension_numbers = #tpu.dot_dimension_numbers<[1], [0], [0], [1], [0, 0, 1, 1], [], []>} : vector<28x96xf32>, vector<96x84xf32>, vector<28x84xf32> -> vector<28x84xf32>
    %33 = arith.addf %24, %29 : vector<28x84xf32>
    %34 = arith.addf %25, %32 : vector<28x84xf32>
    %35 = vector.extract_strided_slice %0 {offsets = [4, 0], sizes = [28, 96], strides = [1, 1]} : vector<32x96xf32> to vector<28x96xf32>
    %c4 = arith.constant 4 : index
    %c0_29 = arith.constant 0 : index
    %c0_30 = arith.constant 0 : index
    %36 = vector.load %arg2[%c4, %c0_29, %c0_30] : memref<5x96x84xf32, #tpu.memory_space<vmem>>, vector<1x96x84xf32>
    %37 = vector.shape_cast %36 : vector<1x96x84xf32> to vector<96x84xf32>
    %cst_31 = arith.constant dense<0.000000e+00> : vector<28x84xf32>
    %38 = tpu.matmul %35, %37, %cst_31 {dimension_numbers = #tpu.dot_dimension_numbers<[1], [0], [0], [1], [0, 0, 1, 1], [], []>} : vector<28x96xf32>, vector<96x84xf32>, vector<28x84xf32> -> vector<28x84xf32>
    %c4_32 = arith.constant 4 : index
    %c0_33 = arith.constant 0 : index
    %c0_34 = arith.constant 0 : index
    %39 = vector.load %arg3[%c4_32, %c0_33, %c0_34] : memref<5x96x84xf32, #tpu.memory_space<vmem>>, vector<1x96x84xf32>
    %40 = vector.shape_cast %39 : vector<1x96x84xf32> to vector<96x84xf32>
    %cst_35 = arith.constant dense<0.000000e+00> : vector<28x84xf32>
    %41 = tpu.matmul %35, %40, %cst_35 {dimension_numbers = #tpu.dot_dimension_numbers<[1], [0], [0], [1], [0, 0, 1, 1], [], []>} : vector<28x96xf32>, vector<96x84xf32>, vector<28x84xf32> -> vector<28x84xf32>
    %42 = arith.addf %33, %38 : vector<28x84xf32>
    %43 = arith.addf %34, %41 : vector<28x84xf32>
    %c0_36 = arith.constant 0 : index
    %c0_37 = arith.constant 0 : index
    %44 = vector.load %arg4[%c0_36, %c0_37] : memref<1x84xf32, #tpu.memory_space<vmem>>, vector<1x84xf32>
    %45 = vector.broadcast %44 : vector<1x84xf32> to vector<28x84xf32>
    %46 = arith.addf %42, %45 : vector<28x84xf32>
    %cst_38 = arith.constant 0.000000e+00 : f32
    %47 = vector.broadcast %cst_38 : f32 to vector<28x84xf32>
    %48 = arith.maximumf %46, %47 : vector<28x84xf32>
    %49 = vector.broadcast %44 : vector<1x84xf32> to vector<28x84xf32>
    %50 = arith.addf %43, %49 : vector<28x84xf32>
    %cst_39 = arith.constant 0.000000e+00 : f32
    %51 = vector.broadcast %cst_39 : f32 to vector<28x84xf32>
    %52 = arith.maximumf %50, %51 : vector<28x84xf32>
    %53 = arith.maximumf %48, %52 : vector<28x84xf32>
    %c0_40 = arith.constant 0 : index
    %c0_41 = arith.constant 0 : index
    %54 = vector.load %arg8[%c0_40, %c0_41] : memref<14x28xf32, #tpu.memory_space<vmem>>, vector<14x28xf32>
    %cst_42 = arith.constant dense<0.000000e+00> : vector<14x84xf32>
    %55 = tpu.matmul %54, %53, %cst_42 {dimension_numbers = #tpu.dot_dimension_numbers<[1], [0], [0], [1], [0, 0, 1, 1], [], []>} : vector<14x28xf32>, vector<28x84xf32>, vector<14x84xf32> -> vector<14x84xf32>
    %c0_43 = arith.constant 0 : index
    %c0_44 = arith.constant 0 : index
    %56 = vector.load %arg9[%c0_43, %c0_44] : memref<14x28xf32, #tpu.memory_space<vmem>>, vector<14x28xf32>
    %cst_45 = arith.constant dense<0.000000e+00> : vector<14x84xf32>
    %57 = tpu.matmul %56, %53, %cst_45 {dimension_numbers = #tpu.dot_dimension_numbers<[1], [0], [0], [1], [0, 0, 1, 1], [], []>} : vector<14x28xf32>, vector<28x84xf32>, vector<14x84xf32> -> vector<14x84xf32>
    %58 = arith.maximumf %55, %57 : vector<14x84xf32>
    %59 = vector.extract_strided_slice %58 {offsets = [0, 0], sizes = [10, 84], strides = [1, 1]} : vector<14x84xf32> to vector<10x84xf32>
    %c0_46 = arith.constant 0 : index
    %c0_47 = arith.constant 0 : index
    %c0_48 = arith.constant 0 : index
    %60 = vector.load %arg5[%c0_46, %c0_47, %c0_48] : memref<5x84x80xf32, #tpu.memory_space<vmem>>, vector<1x84x80xf32>
    %61 = vector.shape_cast %60 : vector<1x84x80xf32> to vector<84x80xf32>
    %cst_49 = arith.constant dense<0.000000e+00> : vector<10x80xf32>
    %62 = tpu.matmul %59, %61, %cst_49 {dimension_numbers = #tpu.dot_dimension_numbers<[1], [0], [0], [1], [0, 0, 1, 1], [], []>} : vector<10x84xf32>, vector<84x80xf32>, vector<10x80xf32> -> vector<10x80xf32>
    %c0_50 = arith.constant 0 : index
    %c0_51 = arith.constant 0 : index
    %c0_52 = arith.constant 0 : index
    %63 = vector.load %arg6[%c0_50, %c0_51, %c0_52] : memref<5x84x80xf32, #tpu.memory_space<vmem>>, vector<1x84x80xf32>
    %64 = vector.shape_cast %63 : vector<1x84x80xf32> to vector<84x80xf32>
    %cst_53 = arith.constant dense<0.000000e+00> : vector<10x80xf32>
    %65 = tpu.matmul %59, %64, %cst_53 {dimension_numbers = #tpu.dot_dimension_numbers<[1], [0], [0], [1], [0, 0, 1, 1], [], []>} : vector<10x84xf32>, vector<84x80xf32>, vector<10x80xf32> -> vector<10x80xf32>
    %66 = vector.extract_strided_slice %58 {offsets = [1, 0], sizes = [10, 84], strides = [1, 1]} : vector<14x84xf32> to vector<10x84xf32>
    %c1_54 = arith.constant 1 : index
    %c0_55 = arith.constant 0 : index
    %c0_56 = arith.constant 0 : index
    %67 = vector.load %arg5[%c1_54, %c0_55, %c0_56] : memref<5x84x80xf32, #tpu.memory_space<vmem>>, vector<1x84x80xf32>
    %68 = vector.shape_cast %67 : vector<1x84x80xf32> to vector<84x80xf32>
    %cst_57 = arith.constant dense<0.000000e+00> : vector<10x80xf32>
    %69 = tpu.matmul %66, %68, %cst_57 {dimension_numbers = #tpu.dot_dimension_numbers<[1], [0], [0], [1], [0, 0, 1, 1], [], []>} : vector<10x84xf32>, vector<84x80xf32>, vector<10x80xf32> -> vector<10x80xf32>
    %c1_58 = arith.constant 1 : index
    %c0_59 = arith.constant 0 : index
    %c0_60 = arith.constant 0 : index
    %70 = vector.load %arg6[%c1_58, %c0_59, %c0_60] : memref<5x84x80xf32, #tpu.memory_space<vmem>>, vector<1x84x80xf32>
    %71 = vector.shape_cast %70 : vector<1x84x80xf32> to vector<84x80xf32>
    %cst_61 = arith.constant dense<0.000000e+00> : vector<10x80xf32>
    %72 = tpu.matmul %66, %71, %cst_61 {dimension_numbers = #tpu.dot_dimension_numbers<[1], [0], [0], [1], [0, 0, 1, 1], [], []>} : vector<10x84xf32>, vector<84x80xf32>, vector<10x80xf32> -> vector<10x80xf32>
    %73 = arith.addf %62, %69 : vector<10x80xf32>
    %74 = arith.addf %65, %72 : vector<10x80xf32>
    %75 = vector.extract_strided_slice %58 {offsets = [2, 0], sizes = [10, 84], strides = [1, 1]} : vector<14x84xf32> to vector<10x84xf32>
    %c2_62 = arith.constant 2 : index
    %c0_63 = arith.constant 0 : index
    %c0_64 = arith.constant 0 : index
    %76 = vector.load %arg5[%c2_62, %c0_63, %c0_64] : memref<5x84x80xf32, #tpu.memory_space<vmem>>, vector<1x84x80xf32>
    %77 = vector.shape_cast %76 : vector<1x84x80xf32> to vector<84x80xf32>
    %cst_65 = arith.constant dense<0.000000e+00> : vector<10x80xf32>
    %78 = tpu.matmul %75, %77, %cst_65 {dimension_numbers = #tpu.dot_dimension_numbers<[1], [0], [0], [1], [0, 0, 1, 1], [], []>} : vector<10x84xf32>, vector<84x80xf32>, vector<10x80xf32> -> vector<10x80xf32>
    %c2_66 = arith.constant 2 : index
    %c0_67 = arith.constant 0 : index
    %c0_68 = arith.constant 0 : index
    %79 = vector.load %arg6[%c2_66, %c0_67, %c0_68] : memref<5x84x80xf32, #tpu.memory_space<vmem>>, vector<1x84x80xf32>
    %80 = vector.shape_cast %79 : vector<1x84x80xf32> to vector<84x80xf32>
    %cst_69 = arith.constant dense<0.000000e+00> : vector<10x80xf32>
    %81 = tpu.matmul %75, %80, %cst_69 {dimension_numbers = #tpu.dot_dimension_numbers<[1], [0], [0], [1], [0, 0, 1, 1], [], []>} : vector<10x84xf32>, vector<84x80xf32>, vector<10x80xf32> -> vector<10x80xf32>
    %82 = arith.addf %73, %78 : vector<10x80xf32>
    %83 = arith.addf %74, %81 : vector<10x80xf32>
    %84 = vector.extract_strided_slice %58 {offsets = [3, 0], sizes = [10, 84], strides = [1, 1]} : vector<14x84xf32> to vector<10x84xf32>
    %c3_70 = arith.constant 3 : index
    %c0_71 = arith.constant 0 : index
    %c0_72 = arith.constant 0 : index
    %85 = vector.load %arg5[%c3_70, %c0_71, %c0_72] : memref<5x84x80xf32, #tpu.memory_space<vmem>>, vector<1x84x80xf32>
    %86 = vector.shape_cast %85 : vector<1x84x80xf32> to vector<84x80xf32>
    %cst_73 = arith.constant dense<0.000000e+00> : vector<10x80xf32>
    %87 = tpu.matmul %84, %86, %cst_73 {dimension_numbers = #tpu.dot_dimension_numbers<[1], [0], [0], [1], [0, 0, 1, 1], [], []>} : vector<10x84xf32>, vector<84x80xf32>, vector<10x80xf32> -> vector<10x80xf32>
    %c3_74 = arith.constant 3 : index
    %c0_75 = arith.constant 0 : index
    %c0_76 = arith.constant 0 : index
    %88 = vector.load %arg6[%c3_74, %c0_75, %c0_76] : memref<5x84x80xf32, #tpu.memory_space<vmem>>, vector<1x84x80xf32>
    %89 = vector.shape_cast %88 : vector<1x84x80xf32> to vector<84x80xf32>
    %cst_77 = arith.constant dense<0.000000e+00> : vector<10x80xf32>
    %90 = tpu.matmul %84, %89, %cst_77 {dimension_numbers = #tpu.dot_dimension_numbers<[1], [0], [0], [1], [0, 0, 1, 1], [], []>} : vector<10x84xf32>, vector<84x80xf32>, vector<10x80xf32> -> vector<10x80xf32>
    %91 = arith.addf %82, %87 : vector<10x80xf32>
    %92 = arith.addf %83, %90 : vector<10x80xf32>
    %93 = vector.extract_strided_slice %58 {offsets = [4, 0], sizes = [10, 84], strides = [1, 1]} : vector<14x84xf32> to vector<10x84xf32>
    %c4_78 = arith.constant 4 : index
    %c0_79 = arith.constant 0 : index
    %c0_80 = arith.constant 0 : index
    %94 = vector.load %arg5[%c4_78, %c0_79, %c0_80] : memref<5x84x80xf32, #tpu.memory_space<vmem>>, vector<1x84x80xf32>
    %95 = vector.shape_cast %94 : vector<1x84x80xf32> to vector<84x80xf32>
    %cst_81 = arith.constant dense<0.000000e+00> : vector<10x80xf32>
    %96 = tpu.matmul %93, %95, %cst_81 {dimension_numbers = #tpu.dot_dimension_numbers<[1], [0], [0], [1], [0, 0, 1, 1], [], []>} : vector<10x84xf32>, vector<84x80xf32>, vector<10x80xf32> -> vector<10x80xf32>
    %c4_82 = arith.constant 4 : index
    %c0_83 = arith.constant 0 : index
    %c0_84 = arith.constant 0 : index
    %97 = vector.load %arg6[%c4_82, %c0_83, %c0_84] : memref<5x84x80xf32, #tpu.memory_space<vmem>>, vector<1x84x80xf32>
    %98 = vector.shape_cast %97 : vector<1x84x80xf32> to vector<84x80xf32>
    %cst_85 = arith.constant dense<0.000000e+00> : vector<10x80xf32>
    %99 = tpu.matmul %93, %98, %cst_85 {dimension_numbers = #tpu.dot_dimension_numbers<[1], [0], [0], [1], [0, 0, 1, 1], [], []>} : vector<10x84xf32>, vector<84x80xf32>, vector<10x80xf32> -> vector<10x80xf32>
    %100 = arith.addf %91, %96 : vector<10x80xf32>
    %101 = arith.addf %92, %99 : vector<10x80xf32>
    %c0_86 = arith.constant 0 : index
    %c0_87 = arith.constant 0 : index
    %102 = vector.load %arg7[%c0_86, %c0_87] : memref<1x80xf32, #tpu.memory_space<vmem>>, vector<1x80xf32>
    %103 = vector.broadcast %102 : vector<1x80xf32> to vector<10x80xf32>
    %104 = arith.addf %100, %103 : vector<10x80xf32>
    %cst_88 = arith.constant 0.000000e+00 : f32
    %105 = vector.broadcast %cst_88 : f32 to vector<10x80xf32>
    %106 = arith.maximumf %104, %105 : vector<10x80xf32>
    %107 = vector.broadcast %102 : vector<1x80xf32> to vector<10x80xf32>
    %108 = arith.addf %101, %107 : vector<10x80xf32>
    %cst_89 = arith.constant 0.000000e+00 : f32
    %109 = vector.broadcast %cst_89 : f32 to vector<10x80xf32>
    %110 = arith.maximumf %108, %109 : vector<10x80xf32>
    %111 = arith.maximumf %106, %110 : vector<10x80xf32>
    %c0_90 = arith.constant 0 : index
    %c0_91 = arith.constant 0 : index
    %112 = vector.load %arg10[%c0_90, %c0_91] : memref<5x10xf32, #tpu.memory_space<vmem>>, vector<5x10xf32>
    %cst_92 = arith.constant dense<0.000000e+00> : vector<5x80xf32>
    %113 = tpu.matmul %112, %111, %cst_92 {dimension_numbers = #tpu.dot_dimension_numbers<[1], [0], [0], [1], [0, 0, 1, 1], [], []>} : vector<5x10xf32>, vector<10x80xf32>, vector<5x80xf32> -> vector<5x80xf32>
    %c0_93 = arith.constant 0 : index
    %c0_94 = arith.constant 0 : index
    %114 = vector.load %arg11[%c0_93, %c0_94] : memref<5x10xf32, #tpu.memory_space<vmem>>, vector<5x10xf32>
    %cst_95 = arith.constant dense<0.000000e+00> : vector<5x80xf32>
    %115 = tpu.matmul %114, %111, %cst_95 {dimension_numbers = #tpu.dot_dimension_numbers<[1], [0], [0], [1], [0, 0, 1, 1], [], []>} : vector<5x10xf32>, vector<10x80xf32>, vector<5x80xf32> -> vector<5x80xf32>
    %116 = arith.maximumf %113, %115 : vector<5x80xf32>
    %117 = vector.extract_strided_slice %116 {offsets = [0, 0], sizes = [1, 80], strides = [1, 1]} : vector<5x80xf32> to vector<1x80xf32>
    %118 = vector.extract_strided_slice %116 {offsets = [1, 0], sizes = [1, 80], strides = [1, 1]} : vector<5x80xf32> to vector<1x80xf32>
    %119 = vector.extract_strided_slice %116 {offsets = [2, 0], sizes = [1, 80], strides = [1, 1]} : vector<5x80xf32> to vector<1x80xf32>
    %120 = vector.extract_strided_slice %116 {offsets = [3, 0], sizes = [1, 80], strides = [1, 1]} : vector<5x80xf32> to vector<1x80xf32>
    %121 = vector.extract_strided_slice %116 {offsets = [4, 0], sizes = [1, 80], strides = [1, 1]} : vector<5x80xf32> to vector<1x80xf32>
    %122 = tpu.concatenate %117, %118, %119, %120, %121 in 1 : vector<1x80xf32>, vector<1x80xf32>, vector<1x80xf32>, vector<1x80xf32>, vector<1x80xf32> -> vector<1x400xf32>
    %c0_96 = arith.constant 0 : index
    %c0_97 = arith.constant 0 : index
    %123 = vector.load %arg13[%c0_96, %c0_97] : memref<400x120xf32, #tpu.memory_space<vmem>>, vector<400x120xf32>
    %cst_98 = arith.constant dense<0.000000e+00> : vector<1x120xf32>
    %124 = tpu.matmul %122, %123, %cst_98 {dimension_numbers = #tpu.dot_dimension_numbers<[1], [0], [0], [1], [0, 0, 1, 1], [], []>} : vector<1x400xf32>, vector<400x120xf32>, vector<1x120xf32> -> vector<1x120xf32>
    %c0_99 = arith.constant 0 : index
    %c0_100 = arith.constant 0 : index
    %125 = vector.load %arg14[%c0_99, %c0_100] : memref<1x120xf32, #tpu.memory_space<vmem>>, vector<1x120xf32>
    %126 = arith.addf %124, %125 : vector<1x120xf32>
    %cst_101 = arith.constant 0.000000e+00 : f32
    %127 = vector.broadcast %cst_101 : f32 to vector<1x120xf32>
    %128 = arith.maximumf %126, %127 : vector<1x120xf32>
    %c0_102 = arith.constant 0 : index
    %c0_103 = arith.constant 0 : index
    %129 = vector.load %arg15[%c0_102, %c0_103] : memref<120x84xf32, #tpu.memory_space<vmem>>, vector<120x84xf32>
    %cst_104 = arith.constant dense<0.000000e+00> : vector<1x84xf32>
    %130 = tpu.matmul %128, %129, %cst_104 {dimension_numbers = #tpu.dot_dimension_numbers<[1], [0], [0], [1], [0, 0, 1, 1], [], []>} : vector<1x120xf32>, vector<120x84xf32>, vector<1x84xf32> -> vector<1x84xf32>
    %c0_105 = arith.constant 0 : index
    %c0_106 = arith.constant 0 : index
    %131 = vector.load %arg16[%c0_105, %c0_106] : memref<1x84xf32, #tpu.memory_space<vmem>>, vector<1x84xf32>
    %132 = arith.addf %130, %131 : vector<1x84xf32>
    %cst_107 = arith.constant 0.000000e+00 : f32
    %133 = vector.broadcast %cst_107 : f32 to vector<1x84xf32>
    %134 = arith.maximumf %132, %133 : vector<1x84xf32>
    %c0_108 = arith.constant 0 : index
    %c0_109 = arith.constant 0 : index
    %135 = vector.load %arg17[%c0_108, %c0_109] : memref<84x10xf32, #tpu.memory_space<vmem>>, vector<84x10xf32>
    %cst_110 = arith.constant dense<0.000000e+00> : vector<1x10xf32>
    %136 = tpu.matmul %134, %135, %cst_110 {dimension_numbers = #tpu.dot_dimension_numbers<[1], [0], [0], [1], [0, 0, 1, 1], [], []>} : vector<1x84xf32>, vector<84x10xf32>, vector<1x10xf32> -> vector<1x10xf32>
    %c0_111 = arith.constant 0 : index
    %c0_112 = arith.constant 0 : index
    %137 = vector.load %arg18[%c0_111, %c0_112] : memref<1x10xf32, #tpu.memory_space<vmem>>, vector<1x10xf32>
    %138 = arith.addf %136, %137 : vector<1x10xf32>
    %cst_113 = arith.constant dense<0xFF800000> : vector<1xf32>
    %139 = vector.multi_reduction <maximumf>, %138, %cst_113 [1] : vector<1x10xf32> to vector<1xf32>
    %140 = vector.shape_cast %139 : vector<1xf32> to vector<1x1xf32>
    %141 = vector.broadcast %140 : vector<1x1xf32> to vector<1x10xf32>
    %142 = arith.subf %138, %141 : vector<1x10xf32>
    %143 = math.exp %142 : vector<1x10xf32>
    %cst_114 = arith.constant dense<0.000000e+00> : vector<1xf32>
    %144 = vector.multi_reduction <add>, %143, %cst_114 [1] : vector<1x10xf32> to vector<1xf32>
    %145 = vector.shape_cast %144 : vector<1xf32> to vector<1x1xf32>
    %146 = math.log %145 : vector<1x1xf32>
    %147 = vector.broadcast %140 : vector<1x1xf32> to vector<1x10xf32>
    %148 = arith.subf %138, %147 : vector<1x10xf32>
    %149 = vector.broadcast %146 : vector<1x1xf32> to vector<1x10xf32>
    %150 = arith.subf %148, %149 : vector<1x10xf32>
    %c0_115 = arith.constant 0 : index
    %c0_116 = arith.constant 0 : index
    %c0_117 = arith.constant 0 : index
    %151 = vector.load %arg19[%c0_115, %c0_116, %c0_117] : memref<1x1x10xf32, #tpu.memory_space<vmem>>, vector<1x1x10xf32>
    %152 = vector.shape_cast %151 : vector<1x1x10xf32> to vector<1x10xf32>
    %153 = vector.shape_cast %150 : vector<1x10xf32> to vector<1x1x10xf32>
    tpu.vector_store %arg19[%c0_115, %c0_116, %c0_117], %153 {strides = array<i32>} : memref<1x1x10xf32, #tpu.memory_space<vmem>>, vector<1x1x10xf32>,
    return
  }
  func.func @transform_0(%arg0: i32) -> (i32, i32) {
    %c0_i32 = arith.constant 0 : i32
    %c0_i32_0 = arith.constant 0 : i32
    return %arg0, %c0_i32 : i32, i32
  }
  func.func @transform_1(%arg0: i32) -> (i32, i32, i32) {
    %c0_i32 = arith.constant 0 : i32
    %c0_i32_0 = arith.constant 0 : i32
    %c0_i32_1 = arith.constant 0 : i32
    %c0_i32_2 = arith.constant 0 : i32
    return %c0_i32, %c0_i32_0, %c0_i32_1 : i32, i32, i32
  }
  func.func @transform_2(%arg0: i32) -> (i32, i32, i32) {
    %c0_i32 = arith.constant 0 : i32
    %c0_i32_0 = arith.constant 0 : i32
    %c0_i32_1 = arith.constant 0 : i32
    %c0_i32_2 = arith.constant 0 : i32
    return %c0_i32, %c0_i32_0, %c0_i32_1 : i32, i32, i32
  }
  func.func @transform_3(%arg0: i32) -> (i32, i32) {
    %c0_i32 = arith.constant 0 : i32
    %c0_i32_0 = arith.constant 0 : i32
    %c0_i32_1 = arith.constant 0 : i32
    return %c0_i32, %c0_i32_0 : i32, i32
  }
  func.func @transform_4(%arg0: i32) -> (i32, i32, i32) {
    %c0_i32 = arith.constant 0 : i32
    %c0_i32_0 = arith.constant 0 : i32
    %c0_i32_1 = arith.constant 0 : i32
    %c0_i32_2 = arith.constant 0 : i32
    return %c0_i32, %c0_i32_0, %c0_i32_1 : i32, i32, i32
  }
  func.func @transform_5(%arg0: i32) -> (i32, i32, i32) {
    %c0_i32 = arith.constant 0 : i32
    %c0_i32_0 = arith.constant 0 : i32
    %c0_i32_1 = arith.constant 0 : i32
    %c0_i32_2 = arith.constant 0 : i32
    return %c0_i32, %c0_i32_0, %c0_i32_1 : i32, i32, i32
  }
  func.func @transform_6(%arg0: i32) -> (i32, i32) {
    %c0_i32 = arith.constant 0 : i32
    %c0_i32_0 = arith.constant 0 : i32
    %c0_i32_1 = arith.constant 0 : i32
    return %c0_i32, %c0_i32_0 : i32, i32
  }
  func.func @transform_7(%arg0: i32) -> (i32, i32) {
    %c0_i32 = arith.constant 0 : i32
    %c0_i32_0 = arith.constant 0 : i32
    %c0_i32_1 = arith.constant 0 : i32
    return %c0_i32, %c0_i32_0 : i32, i32
  }
  func.func @transform_8(%arg0: i32) -> (i32, i32) {
    %c0_i32 = arith.constant 0 : i32
    %c0_i32_0 = arith.constant 0 : i32
    %c0_i32_1 = arith.constant 0 : i32
    return %c0_i32, %c0_i32_0 : i32, i32
  }
  func.func @transform_9(%arg0: i32) -> (i32, i32) {
    %c0_i32 = arith.constant 0 : i32
    %c0_i32_0 = arith.constant 0 : i32
    %c0_i32_1 = arith.constant 0 : i32
    return %c0_i32, %c0_i32_0 : i32, i32
  }
  func.func @transform_10(%arg0: i32) -> (i32, i32) {
    %c0_i32 = arith.constant 0 : i32
    %c0_i32_0 = arith.constant 0 : i32
    %c0_i32_1 = arith.constant 0 : i32
    return %c0_i32, %c0_i32_0 : i32, i32
  }
  func.func @transform_11(%arg0: i32) -> (i32, i32, i32) {
    %c0_i32 = arith.constant 0 : i32
    %c0_i32_0 = arith.constant 0 : i32
    %c0_i32_1 = arith.constant 0 : i32
    %c0_i32_2 = arith.constant 0 : i32
    return %c0_i32, %c0_i32_0, %c0_i32_1 : i32, i32, i32
  }
  func.func @transform_12(%arg0: i32) -> (i32, i32) {
    %c0_i32 = arith.constant 0 : i32
    %c0_i32_0 = arith.constant 0 : i32
    %c0_i32_1 = arith.constant 0 : i32
    return %c0_i32, %c0_i32_0 : i32, i32
  }
  func.func @transform_13(%arg0: i32) -> (i32, i32) {
    %c0_i32 = arith.constant 0 : i32
    %c0_i32_0 = arith.constant 0 : i32
    %c0_i32_1 = arith.constant 0 : i32
    return %c0_i32, %c0_i32_0 : i32, i32
  }
  func.func @transform_14(%arg0: i32) -> (i32, i32) {
    %c0_i32 = arith.constant 0 : i32
    %c0_i32_0 = arith.constant 0 : i32
    %c0_i32_1 = arith.constant 0 : i32
    return %c0_i32, %c0_i32_0 : i32, i32
  }
  func.func @transform_15(%arg0: i32) -> (i32, i32) {
    %c0_i32 = arith.constant 0 : i32
    %c0_i32_0 = arith.constant 0 : i32
    %c0_i32_1 = arith.constant 0 : i32
    return %c0_i32, %c0_i32_0 : i32, i32
  }
  func.func @transform_16(%arg0: i32) -> (i32, i32) {
    %c0_i32 = arith.constant 0 : i32
    %c0_i32_0 = arith.constant 0 : i32
    %c0_i32_1 = arith.constant 0 : i32
    return %c0_i32, %c0_i32_0 : i32, i32
  }
  func.func @transform_17(%arg0: i32) -> (i32, i32) {
    %c0_i32 = arith.constant 0 : i32
    %c0_i32_0 = arith.constant 0 : i32
    %c0_i32_1 = arith.constant 0 : i32
    return %c0_i32, %c0_i32_0 : i32, i32
  }
  func.func @transform_18(%arg0: i32) -> (i32, i32, i32) {
    %c0_i32 = arith.constant 0 : i32
    %c0_i32_0 = arith.constant 0 : i32
    %c0_i32_1 = arith.constant 0 : i32
    return %arg0, %c0_i32, %c0_i32_0 : i32, i32, i32
  }
}

</mosaic_0001>

<bundles_post_ra>
// kernel: convnet_forward.1
= control target key start
LH: loop header
LB: loop body
LE: loop exit
PB: predicated region body
PF: predicated region fallthrough
CT: control target
= control target key end

     0   :  { %s6884_s0 = inlined_call_operand.vmem [shape: f32[64,96], index: 0, kind: input, shape index: {}]   ;;  %s6885_s1 = inlined_call_operand.vmem [shape: f32[5,96,84], index: 1, kind: input, shape index: {}]   ;;  %s6886_s2 = inlined_call_operand.vmem [shape: f32[5,96,84], index: 2, kind: input, shape index: {}]   ;;  %s6887_s3 = inlined_call_operand.vmem [shape: f32[1,84], index: 3, kind: input, shape index: {}]   ;;  %s6888_s4 = inlined_call_operand.vmem [shape: f32[5,84,80], index: 4, kind: input, shape index: {}]   ;;  %s6889_s5 = inlined_call_operand.vmem [shape: f32[5,84,80], index: 5, kind: input, shape index: {}]   ;;  %s6890_s6 = inlined_call_operand.vmem [shape: f32[1,80], index: 6, kind: input, shape index: {}]   ;;  %s6891_s7 = inlined_call_operand.vmem [shape: f32[14,28], index: 7, kind: input, shape index: {}]   ;;  %s6892_s8 = inlined_call_operand.vmem [shape: f32[14,28], index: 8, kind: input, shape index: {}]   ;;  %s6893_s9 = inlined_call_operand.vmem [shape: f32[5,10], index: 9, kind: input, shape index: {}]   ;;  %s6894_s10 = inlined_call_operand.vmem [shape: f32[5,10], index: 10, kind: input, shape index: {}]   ;;  %s6895_s11 = inlined_call_operand.vmem [shape: f32[5,1,5], index: 11, kind: input, shape index: {}]   ;;  %s6896_s12 = inlined_call_operand.vmem [shape: f32[400,120], index: 12, kind: input, shape index: {}]   ;;  %s6897_s13 = inlined_call_operand.vmem [shape: f32[1,120], index: 13, kind: input, shape index: {}]   ;;  %s6898_s14 = inlined_call_operand.vmem [shape: f32[120,84], index: 14, kind: input, shape index: {}]   ;;  %s6899_s15 = inlined_call_operand.vmem [shape: f32[1,84], index: 15, kind: input, shape index: {}]   ;;  %s6900_s16 = inlined_call_operand.vmem [shape: f32[84,10], index: 16, kind: input, shape index: {}]   ;;  %s6901_s17 = inlined_call_operand.vmem [shape: f32[1,10], index: 17, kind: input, shape index: {}]   ;;  %s6902_s18 = inlined_call_operand.hbm [shape: f32[2,1,10], index: 18, kind: output, shape index: {}]  }
   0x1   :  { %6914 = sst [smem:[#allocation12_spill]] %s6884_s0 }
   0x2   :  { %6915 = sst [smem:[#allocation13_spill]] %s6885_s1 }
   0x3   :  { %6916 = sst [smem:[#allocation14_spill]] %s6886_s2 }
   0x4   :  { %6917 = sst [smem:[#allocation15_spill]] %s6902_s18 }
   0x5   :  { %23 = vsyncpa [#allocation3], 0 }
   0x6   :  { %25 = vsyncpa [#allocation3 + $0x1], 0  ;;  %s5578_s26 = smov 0   ;;  %s5580_s27 = smov 0  }
   0x7   :  { %s5582_s28 = smov 0   ;;  %s5584_s29 = smov 0  }
   0x8 LB: > { %6918 = sst [smem:[#allocation5_spill]] %s5460_s26  ;;  %s5599_s30 = sadd.s32 4294967295, %s5472_s29   ;;  %s5472_s29 = sphi %s5584_s29, %s6935_s29   ;;  %s5468_s28 = sphi %s5582_s28, %s6937_s28   ;;  %s5464_s27 = sphi %s5580_s27, %s6939_s27   ;;  %s5460_s26 = sphi %s5578_s26, %s6938_s26  }
   0x9   : > { %6919 = sst [smem:[#allocation6_spill]] %s5468_s28  ;;  %s3454_s0 = sadd.s32 4294967294, %s5472_s29  }
   0xa   : > { %6920 = sst [smem:[#allocation7_spill]] %s5472_s29  ;;  %s5603_s19 = sadd.s32 1, %s5472_s29  }
   0xb   : > { %6921 = sst [smem:[#allocation8_spill]] %s5603_s19  ;;  %s421_s1 = sadd.s32 1, %s5468_s28 }
   0xc   : > { %s418_s20 = ssub.s32 %s5472_s29, %s5603_s19  ;;  %p431_p0 = scmp.ne.s32.totalorder %s5468_s28, %s5464_s27 }
   0xd   : > { %p419_p1 = scmp.eq.s32.totalorder %s418_s20, 0  ;;  %p432_p2 = scmp.eq.s32.totalorder %s5599_s30, 1 }
   0xe   : > { %p437_p3 = scmp.ne.s32.totalorder %s5464_s27, %s5460_s26  ;;  %p438_p4 = scmp.eq.s32.totalorder %s3454_s0, 1 }
   0xf   : > { %s5614_s21 = scalar_select %p419_p1, %s5468_s28, %s421_s1  }
  0x10   : > { %p5616_p5 = por %p432_p2, %p431_p0  ;;  %p5620_p6 = por %p438_p4, %p437_p3 }
  0x11   : > { %6922 = sst [smem:[#allocation9_spill]] %s5614_s21  ;;  %p3457_p7 = scmp.ge.s32.totalorder %s5472_s29, 1 }
  0x12   : > { %s6923_s22 = scalar_select %p5616_p5, 1, 0 }
  0x13   : > { %s6925_s2 = scalar_select %p5620_p6, 1, 0 }
  0x14   : > { %6924 = sst [smem:[#allocation10_spill]] %s6923_s22  ;;  %p516_p8 = scmp.lt.s32.totalorder %s5472_s29, 3 }
  0x15   : > { %6926 = sst [smem:[#allocation11_spill]] %s6925_s2 }
  0x16   : > { %p517_p9 = pnand %p3457_p7, %p516_p8 }
  0x17   : > { %s6927_s25 = sld [smem:[#allocation13_spill]] (!%p517_p9)  ;;  %s6928_s21 = sld [smem:[#allocation14_spill]] (!%p517_p9)  ;;  %vm620_vm0 = vcmask (!%p517_p9), 1046528   ;;  %vm628_vm1 = vcmask (!%p517_p9), 785408   ;;  %vm1231_vm2 = vcmask (!%p517_p9), 1044480   ;;  %vm1451_vm3 = vcmask (!%p517_p9), 1043456  }
  0x18   : > { %520 = sbr.rel (%p517_p9) target bundleno = 2236 (0x8bc), region = 92  ;;  %s3458_s28 = sshll.u32 (!%p517_p9), %s5599_s30, 2  ;;  %vm1011_vm4 = vcmask (!%p517_p9), 1045504   ;;  %vm1687_vm5 = vcmask (!%p517_p9), 228352   ;;  %vm5474_vm6 = vmmov (!%p517_p9), 1   ;;  %vm1896_vm8 = vcmask (!%p517_p9), 687104  }
  0x19   : > { %p570_p10 = scmp.lt.s32.totalorder (!%p517_p9), %s3458_s28, 7  ;;  %s6929_s24 = sld [smem:[#allocation12_spill]] (!%p517_p9)  ;;  %vm4993_vm7 = vmpackc.low (!%p517_p9), %vm1451_vm3, %vm5474_vm6  ;;  %vm5476_vm9 = vmmov (!%p517_p9), 0   ;;  %vm2824_vm10 = vcmask (!%p517_p9), 1041408   ;;  %vm2820_vm12 = vcmask (!%p517_p9), 80896   ;;  %vm2996_vm13 = vcmask (!%p517_p9), 523264  }
  0x1a   : > { %vm5210_vm11 = vmpackc.low (!%p517_p9), %vm2824_vm10, %vm5474_vm6  ;;  %s5479_s18 = smov (!%p517_p9), 80   ;;  %s5480_s22 = smov (!%p517_p9), 64   ;;  %vm2992_vm14 = vcmask (!%p517_p9), 261120   ;;  %vm3049_vm15 = vcmask (!%p517_p9), 130048  }
  0x1b   : > { %s3730_s0 = sshll.u32 (!%p517_p9), %s5599_s30, 4  ;;  %s6931_s20 = sld [smem:[#allocation15_spill]] (!%p517_p9) }
  0x1c   : > { %s5482_s30 = smov (!%p517_p9), [#allocation2]  }
  0x1d   : > { %v3460_v0 = vld [vmem:[%s6927_s25 + $0x60] sm:$0xff] (!%p517_p9)  ;;  %v3461_v1 = vld [vmem:[%s6927_s25 + $0x68] sm:$0xff] (!%p517_p9)  ;;  %v3462_v5 = vld [vmem:[%s6927_s25 + $0x70] sm:$0xff] (!%p517_p9)  ;;  %s5414_s26 = sshll.u32 (!%p517_p9), %s5482_s30, 4  ;;  %s5415_s26 = int_to_ptr.vmem [resolvable:$false] %s5414_s26 }
  0x1e   : > { %v3476_v2 = vld [vmem:[%s6928_s21 + $0x60] sm:$0xff] (!%p517_p9)  ;;  %v4748_v3 = vpack.c.bf16 (!%p517_p9), %v3461_v1, %v3460_v0  ;;  %v3477_v4 = vld [vmem:[%s6928_s21 + $0x68] sm:$0xff] (!%p517_p9)  ;;  %v3463_v6 = vld [vmem:[%s6927_s25 + $0x78] sm:$0xff] (!%p517_p9)  ;;  %s5416_s29 = scalar_lea.vmem (!%p517_p9), %s5415_s26, 32 }
  0x1f   : > { %v4772_v7 = vpack.c.bf16 %v3477_v4, %v3476_v2  ;;  %v4752_v8 = vpack.c.bf16 %v3463_v6, %v3462_v5  ;;  %v3478_v9 = vld [vmem:[%s6928_s21 + $0x70] sm:$0xff]  ;;  %v3479_v10 = vld [vmem:[%s6928_s21 + $0x78] sm:$0xff]  ;;  %v3464_v11 = vld [vmem:[%s6927_s25 + $0x80] sm:$0xff]  ;;  %s6941_s28 = smov (!%p570_p10, %s3458_s28), 7 }
  0x20   : > { %4749 = vmatprep.subr.bf16.mxu0 %v4748_v3  ;;  %v4776_v12 = vpack.c.bf16 %v3479_v10, %v3478_v9  ;;  %v3465_v13 = vld [vmem:[%s6927_s25 + $0x88] sm:$0xff]  ;;  %v3480_v14 = vld [vmem:[%s6928_s21 + $0x80] sm:$0xff]  ;;  %s3459_s1 = sshll.u32 %s6941_s28, 3  ;;  %v3466_v18 = vld [vmem:[%s6927_s25 + $0x90] sm:$0xff]  ;;  %s5478_s28 = smov 112  }
  0x21   : > { %v3481_v15 = vld [vmem:[%s6928_s21 + $0x88] sm:$0xff]  ;;  %4773 = vmatprep.subr.bf16.mxu1 %v4772_v7  ;;  %4751 = vmatpush3.bf16.msra.mxu0 %v4748_v3  ;;  %v4756_v16 = vpack.c.bf16 %v3465_v13, %v3464_v11  ;;  %v3467_v19 = vld [vmem:[%s6927_s25 + $0x98] sm:$0xff]  ;;  %s5672_s11 = scalar_lea.vmem %s6929_s24, %s3459_s1  ;;  %v3482_v20 = vld [vmem:[%s6928_s21 + $0x90] sm:$0xff]  ;;  %s5481_s1 = smov 32  }
  0x22   : > { %4775 = vmatpush3.bf16.msra.mxu1 %v4772_v7  ;;  %4753 = vmatprep.subr.bf16.mxu0 %v4752_v8  ;;  %v4780_v17 = vpack.c.bf16 %v3481_v15, %v3480_v14  ;;  %v3483_v21 = vld [vmem:[%s6928_s21 + $0x98] sm:$0xff]  ;;  %v5681_v22 = vld [vmem:[%s5672_s11] sm:$0xff]  ;;  %v5684_v23 = vld [vmem:[%s5672_s11 + $0x8] sm:$0xff]  ;;  %v4760_v24 = vpack.c.bf16 %v3467_v19, %v3466_v18  ;;  %s567_s24 = sand.u32 1, %s5464_s27  }
  0x23   : > { %4777 = vmatprep.subr.bf16.mxu1 %v4776_v12  ;;  %v621_v25 = vrot.slane %v5681_v22, 1  ;;  %v622_v26 = vrot.slane %v5684_v23, 1  ;;  %v4784_v27 = vpack.c.bf16 %v3483_v21, %v3482_v20  ;;  %v3468_v28 = vld [vmem:[%s6927_s25 + $0xa0] sm:$0xff]  ;;  %v3469_v29 = vld [vmem:[%s6927_s25 + $0xa8] sm:$0xff]  ;;  %v1232_v30 = vrot.slane %v5681_v22, 3  ;;  %v5705_v34 = vld [vmem:[%s5672_s11 + $0x10] sm:$0xff] }
  0x24   : > { %v3484_v31 = vld [vmem:[%s6928_s21 + $0xa0] sm:$0xff]  ;;  %v3485_v32 = vld [vmem:[%s6928_s21 + $0xa8] sm:$0xff]  ;;  %v1233_v35 = vrot.slane %v5684_v23, 3  ;;  %v1235_v36 = vrot.slane %v5705_v34, 3  ;;  %v4764_v37 = vpack.c.bf16 %v3469_v29, %v3468_v28  ;;  %v1452_v38 = vrot.slane %v5681_v22, 4  ;;  %v3470_v40 = vld [vmem:[%s6927_s25 + $0xb0] sm:$0xff] }
  0x25   : > { %4755 = vmatpush3.bf16.msra.mxu0 %v4752_v8  ;;  %v623_v33 = vsel %vm620_vm0, %v621_v25, %v622_v26  ;;  %v4788_v39 = vpack.c.bf16 %v3485_v32, %v3484_v31  ;;  %v3471_v41 = vld [vmem:[%s6927_s25 + $0xb8] sm:$0xff]  ;;  %v1453_v43 = vrot.slane %v5684_v23, 4  ;;  %v3486_v44 = vld [vmem:[%s6928_s21 + $0xb0] sm:$0xff]  ;;  %v1455_v48 = vrot.slane %v5705_v34, 4  ;;  %v579_v55 = vld [vmem:[%s6927_s25] sm:$0xff]  ;;  %s3387_s19 = scalar_lea.sflag [#allocation3], %s567_s24 }
  0x26   : > { %4779 = vmatpush3.bf16.msra.mxu1 %v4776_v12  ;;  %4757 = vmatprep.subr.bf16.mxu0 %v4756_v16  ;;  %v5719_v42 = vsel %vm1231_vm2, %v1232_v30, %v1233_v35  ;;  %v3487_v45 = vld [vmem:[%s6928_s21 + $0xb8] sm:$0xff]  ;;  %v5732_v47 = vsel %vm1231_vm2, %v1233_v35, %v1235_v36  ;;  %v4768_v50 = vpack.c.bf16 %v3471_v41, %v3470_v40  ;;  %v580_v56 = vld [vmem:[%s6927_s25 + $0x8] sm:$0xff]  ;;  %v591_v57 = vld [vmem:[%s6928_s21] sm:$0xff]  ;;  %v624_v61 = vrot.slane %v5705_v34, 1 }
  0x27   : > { %4781 = vmatprep.subr.bf16.mxu1 %v4780_v17  ;;  %4128 = vmatprep.mubr.msk.f32.mxu0 %vm628_vm1, %v623_v33  ;;  %v5729_v46 = vld [vmem:[%s5672_s11 + $0x18] sm:$0xff]  ;;  %v5739_v51 = vsel %vm1451_vm3, %v1452_v38, %v1453_v43  ;;  %v5742_v52 = vsel %vm1451_vm3, %v1453_v43, %v1455_v48  ;;  %v4792_v54 = vpack.c.bf16 %v3487_v45, %v3486_v44  ;;  %v592_v58 = vld [vmem:[%s6928_s21 + $0x8] sm:$0xff]  ;;  %v581_v0 = vld [vmem:[%s6927_s25 + $0x10] sm:$0xff]  ;;  %s6841_s11 = scalar_lea.hbm %s6931_s20, %s3730_s0 }
  0x28   : > { %4158 = vmatprep.mubr.msk.f32.mxu1 %vm628_vm1, %v623_v33  ;;  %v5736_v49 = vrot.slane %v5729_v46, 3  ;;  %v5745_v53 = vrot.slane %v5729_v46, 4  ;;  %v4796_v62 = vpack.c.bf16 %v580_v56, %v579_v55  ;;  %v4820_v63 = vpack.c.bf16 %v592_v58, %v591_v57  ;;  %v582_v1 = vld [vmem:[%s6927_s25 + $0x18] sm:$0xff]  ;;  %v593_v2 = vld [vmem:[%s6928_s21 + $0x10] sm:$0xff]  ;;  %v583_v8 = vld [vmem:[%s6927_s25 + $0x20] sm:$0xff] }
  0x29   : > { %4759 = vmatpush3.bf16.msra.mxu0 %v4756_v16  ;;  %v594_v3 = vld [vmem:[%s6928_s21 + $0x18] sm:$0xff]  ;;  %v626_v4 = vrot.slane %v5729_v46, 1  ;;  %v625_v5 = vsel %vm620_vm0, %v622_v26, %v624_v61  ;;  %v4800_v6 = vpack.c.bf16 %v582_v1, %v581_v0  ;;  %v584_v9 = vld [vmem:[%s6927_s25 + $0x28] sm:$0xff]  ;;  %v595_v10 = vld [vmem:[%s6928_s21 + $0x20] sm:$0xff] }
  0x2a   : > { %4783 = vmatpush3.bf16.msra.mxu1 %v4780_v17  ;;  %4761 = vmatprep.subr.bf16.mxu0 %v4760_v24  ;;  %v5761_v59 = vsel %vm1231_vm2, %v1235_v36, %v5736_v49  ;;  %v5765_v60 = vsel %vm1451_vm3, %v1455_v48, %v5745_v53  ;;  %v4824_v7 = vpack.c.bf16 %v594_v3, %v593_v2  ;;  %v596_v11 = vld [vmem:[%s6928_s21 + $0x28] sm:$0xff]  ;;  %v585_v15 = vld [vmem:[%s6927_s25 + $0x30] sm:$0xff]  ;;  %v586_v16 = vld [vmem:[%s6927_s25 + $0x38] sm:$0xff] }
  0x2b   : > { %4785 = vmatprep.subr.bf16.mxu1 %v4784_v27  ;;  %v627_v12 = vsel %vm620_vm0, %v624_v61, %v626_v4  ;;  %v4804_v13 = vpack.c.bf16 %v584_v9, %v583_v8  ;;  %v4828_v14 = vpack.c.bf16 %v596_v11, %v595_v10  ;;  %v597_v17 = vld [vmem:[%s6928_s21 + $0x30] sm:$0xff]  ;;  %v598_v18 = vld [vmem:[%s6928_s21 + $0x38] sm:$0xff]  ;;  %v4808_v19 = vpack.c.bf16 %v586_v16, %v585_v15  ;;  %v587_v21 = vld [vmem:[%s6927_s25 + $0x40] sm:$0xff] }
  0x2c   : > { %v4832_v20 = vpack.c.bf16 %v598_v18, %v597_v17  ;;  %v599_v25 = vld [vmem:[%s6928_s21 + $0x40] sm:$0xff]  ;;  %v600_v26 = vld [vmem:[%s6928_s21 + $0x48] sm:$0xff]  ;;  %v589_v29 = vld [vmem:[%s6927_s25 + $0x50] sm:$0xff]  ;;  %v1012_v61 = vrot.slane %v5681_v22, 2 }
  0x2d   : > { %4763 = vmatpush3.bf16.msra.mxu0 %v4760_v24  ;;  %v588_v24 = vld [vmem:[%s6927_s25 + $0x48] sm:$0xff]  ;;  %v4836_v28 = vpack.c.bf16 %v600_v26, %v599_v25  ;;  %v590_v30 = vld [vmem:[%s6927_s25 + $0x58] sm:$0xff]  ;;  %v601_v31 = vld [vmem:[%s6928_s21 + $0x50] sm:$0xff]  ;;  %v1015_v25 = vrot.slane %v5705_v34, 2 }
  0x2e   : > { %4787 = vmatpush3.bf16.msra.mxu1 %v4784_v27  ;;  %4765 = vmatprep.subr.bf16.mxu0 %v4764_v37  ;;  %v4812_v27 = vpack.c.bf16 %v588_v24, %v587_v21  ;;  %v602_v32 = vld [vmem:[%s6928_s21 + $0x58] sm:$0xff]  ;;  %v4816_v33 = vpack.c.bf16 %v590_v30, %v589_v29  ;;  %v3500_v36 = vld [vmem:[%s6927_s25 + $0xc0] sm:$0xff]  ;;  %v3502_v43 = vld [vmem:[%s6927_s25 + $0xd0] sm:$0xff] }
  0x2f   : > { %4789 = vmatprep.subr.bf16.mxu1 %v4788_v39  ;;  %v4840_v35 = vpack.c.bf16 %v602_v32, %v601_v31  ;;  %v3516_v38 = vld [vmem:[%s6928_s21 + $0xc0] sm:$0xff]  ;;  %v3503_v44 = vld [vmem:[%s6927_s25 + $0xd8] sm:$0xff]  ;;  %v3518_v45 = vld [vmem:[%s6928_s21 + $0xd0] sm:$0xff]  ;;  %v1017_v31 = vrot.slane %v5729_v46, 2 }
  0x30   : > { %v3519_v48 = vld [vmem:[%s6928_s21 + $0xd8] sm:$0xff]  ;;  %v3504_v55 = vld [vmem:[%s6927_s25 + $0xe0] sm:$0xff]  ;;  %v3505_v56 = vld [vmem:[%s6927_s25 + $0xe8] sm:$0xff] }
  0x31   : > { %4767 = vmatpush3.bf16.msra.mxu0 %v4764_v37  ;;  %v3501_v37 = vld [vmem:[%s6927_s25 + $0xc8] sm:$0xff]  ;;  %v3520_v57 = vld [vmem:[%s6928_s21 + $0xe0] sm:$0xff]  ;;  %v3506_v1 = vld [vmem:[%s6927_s25 + $0xf0] sm:$0xff] }
  0x32   : > { %4791 = vmatpush3.bf16.msra.mxu1 %v4788_v39  ;;  %4769 = vmatprep.subr.bf16.mxu0 %v4768_v50  ;;  %v3517_v39 = vld [vmem:[%s6928_s21 + $0xc8] sm:$0xff]  ;;  %v4844_v40 = vpack.c.bf16 %v3501_v37, %v3500_v36  ;;  %v3522_v2 = vld [vmem:[%s6928_s21 + $0xf0] sm:$0xff]  ;;  %v3523_v3 = vld [vmem:[%s6928_s21 + $0xf8] sm:$0xff] }
  0x33   : > { %4793 = vmatprep.subr.bf16.mxu1 %v4792_v54  ;;  %v4868_v41 = vpack.c.bf16 %v3517_v39, %v3516_v38  ;;  %v3521_v58 = vld [vmem:[%s6928_s21 + $0xe8] sm:$0xff]  ;;  %v3524_v9 = vld [vmem:[%s6928_s21 + $0x100] sm:$0xff]  ;;  %v3526_v15 = vld [vmem:[%s6928_s21 + $0x110] sm:$0xff]  ;;  %v1018_v38 = vsel %vm1011_vm4, %v1015_v25, %v1017_v31 }
  0x34   : > { %v4876_v0 = vpack.c.bf16 %v3521_v58, %v3520_v57  ;;  %v3509_v8 = vld [vmem:[%s6927_s25 + $0x108] sm:$0xff]  ;;  %v3527_v16 = vld [vmem:[%s6928_s21 + $0x118] sm:$0xff]  ;;  %v3548_v21 = vld [vmem:[%s6928_s21 + $0x120] sm:$0xff] }
  0x35   : > { %4771 = vmatpush3.bf16.msra.mxu0 %v4768_v50  ;;  %v4848_v50 = vpack.c.bf16 %v3503_v44, %v3502_v43  ;;  %v3525_v10 = vld [vmem:[%s6928_s21 + $0x108] sm:$0xff]  ;;  %v4888_v18 = vpack.c.bf16 %v3527_v16, %v3526_v15  ;;  %v3535_v29 = vld [vmem:[%s6927_s25 + $0x138] sm:$0xff]  ;;  %v3550_v30 = vld [vmem:[%s6928_s21 + $0x130] sm:$0xff] }
  0x36   : > { %4795 = vmatpush3.bf16.msra.mxu1 %v4792_v54  ;;  %4797 = vmatprep.subr.bf16.mxu0 %v4796_v62  ;;  %v4872_v54 = vpack.c.bf16 %v3519_v48, %v3518_v45  ;;  %v3549_v24 = vld [vmem:[%s6928_s21 + $0x128] sm:$0xff]  ;;  %v3536_v36 = vld [vmem:[%s6927_s25 + $0x140] sm:$0xff]  ;;  %v3539_v43 = vld [vmem:[%s6927_s25 + $0x158] sm:$0xff] }
  0x37   : > { %4821 = vmatprep.subr.bf16.mxu1 %v4820_v63  ;;  %v3537_v37 = vld [vmem:[%s6927_s25 + $0x148] sm:$0xff]  ;;  %v3554_v44 = vld [vmem:[%s6928_s21 + $0x150] sm:$0xff]  ;;  %v3555_v45 = vld [vmem:[%s6928_s21 + $0x158] sm:$0xff] }
  0x38   : > { %4129 = vmatmul.mubr.msk.f32.vlgmr.msra.gmra.mrb[0].mxu0 %vm628_vm1, %v625_v5  ;;  %v4900_v39 = vpack.c.bf16 %v3537_v37, %v3536_v36  ;;  %v3557_v57 = vld [vmem:[%s6928_s21 + $0x168] sm:$0xff]  ;;  %v3584_v16 = vld [vmem:[%s6928_s21 + $0x1a0] sm:$0xff] }
  0x39   : > { %4159 = vmatmul.mubr.msk.f32.vlgmr.msra.gmra.mrb[0].mxu1 %vm628_vm1, %v625_v5  ;;  %4799 = vmatpush3.bf16.msra.mxu0 %v4796_v62  ;;  %v1013_v62 = vrot.slane %v5684_v23, 2  ;;  %v3569_v15 = vld [vmem:[%s6927_s25 + $0x1a8] sm:$0xff]  ;;  %v1685_v36 = vld [vmem:[%s6891_s7] sm:$0xff] }
  0x3a   : > { %4823 = vmatpush3.bf16.msra.mxu1 %v4820_v63  ;;  %4801 = vmatprep.subr.bf16.mxu0 %v4800_v6  ;;  %v4852_v63 = vpack.c.bf16 %v3505_v56, %v3504_v55  ;;  %v3541_v55 = vld [vmem:[%s6927_s25 + $0x168] sm:$0xff]  ;;  %v3556_v56 = vld [vmem:[%s6928_s21 + $0x160] sm:$0xff] }
  0x3b   : > { %4825 = vmatprep.subr.bf16.mxu1 %v4824_v7  ;;  %4131 = vmatprep.mubr.msk.f32.mxu0 %vm628_vm1, %v627_v12  ;;  %v1016_v32 = vsel %vm1011_vm4, %v1013_v62, %v1015_v25 }
  0x3c   : > { %4161 = vmatprep.mubr.msk.f32.mxu1 %vm628_vm1, %v627_v12  ;;  %4132 = vmatmul.mubr.msk.f32.gmra.mrb[2].mxu0 %vm628_vm1, %v626_v4  ;;  %v4884_v12 = vpack.c.bf16 %v3525_v10, %v3524_v9  ;;  %v3567_v9 = vld [vmem:[%s6927_s25 + $0x198] sm:$0xff]  ;;  %v3582_v10 = vld [vmem:[%s6928_s21 + $0x190] sm:$0xff] }
  0x3d   : > { %4803 = vmatpush3.bf16.msra.mxu0 %v4800_v6  ;;  %4162 = vmatmul.mubr.msk.f32.gmra.mrb[2].mxu1 %vm628_vm1, %v626_v4  ;;  %v1014_v4 = vsel %vm1011_vm4, %v1012_v61, %v1013_v62  ;;  %v4880_v6 = vpack.c.bf16 %v3523_v3, %v3522_v2  ;;  %v4932_v61 = vpack.c.bf16 %v3557_v57, %v3556_v56  ;;  %v3542_v62 = vld [vmem:[%s6927_s25 + $0x170] sm:$0xff]  ;;  %v3564_v2 = vld [vmem:[%s6927_s25 + $0x180] sm:$0xff]  ;;  %v3565_v3 = vld [vmem:[%s6927_s25 + $0x188] sm:$0xff] }
  0x3e   : > { %4827 = vmatpush3.bf16.msra.mxu1 %v4824_v7  ;;  %4805 = vmatprep.subr.bf16.mxu0 %v4804_v13  ;;  %v3508_v7 = vld [vmem:[%s6927_s25 + $0x100] sm:$0xff] }
  0x3f   : > { %4829 = vmatprep.subr.bf16.mxu1 %v4828_v14  ;;  %4188 = vmatprep.mubr.msk.f32.mxu0 %vm628_vm1, %v5681_v22  ;;  %v4860_v11 = vpack.c.bf16 %v3509_v8, %v3508_v7  ;;  %v3566_v8 = vld [vmem:[%s6927_s25 + $0x190] sm:$0xff] }
  0x40   : > { %4218 = vmatprep.mubr.msk.f32.mxu1 %vm628_vm1, %v5681_v22  ;;  %v3507_v22 = vld [vmem:[%s6927_s25 + $0xf8] sm:$0xff] }
  0x41   : > { %4807 = vmatpush3.bf16.msra.mxu0 %v4804_v13  ;;  %v4856_v5 = vpack.c.bf16 %v3507_v22, %v3506_v1  ;;  %v3510_v13 = vld [vmem:[%s6927_s25 + $0x110] sm:$0xff] }
  0x42   : > { %4831 = vmatpush3.bf16.msra.mxu1 %v4828_v14  ;;  %4809 = vmatprep.subr.bf16.mxu0 %v4808_v19  ;;  %v3511_v14 = vld [vmem:[%s6927_s25 + $0x118] sm:$0xff] }
  0x43   : > { %4833 = vmatprep.subr.bf16.mxu1 %v4832_v20  ;;  %v4864_v17 = vpack.c.bf16 %v3511_v14, %v3510_v13  ;;  %v3568_v14 = vld [vmem:[%s6927_s25 + $0x1a0] sm:$0xff] }
  0x45   : > { %4811 = vmatpush3.bf16.msra.mxu0 %v4808_v19  ;;  %v3532_v19 = vld [vmem:[%s6927_s25 + $0x120] sm:$0xff] }
  0x46   : > { %4835 = vmatpush3.bf16.msra.mxu1 %v4832_v20  ;;  %4813 = vmatprep.subr.bf16.mxu0 %v4812_v27  ;;  %v3533_v20 = vld [vmem:[%s6927_s25 + $0x128] sm:$0xff] }
  0x47   : > { %4837 = vmatprep.subr.bf16.mxu1 %v4836_v28  ;;  %v4892_v26 = vpack.c.bf16 %v3533_v20, %v3532_v19  ;;  %v3570_v20 = vld [vmem:[%s6927_s25 + $0x1b0] sm:$0xff] }
  0x49   : > { %4815 = vmatpush3.bf16.msra.mxu0 %v4812_v27  ;;  %v4916_v27 = vpack.c.bf16 %v3549_v24, %v3548_v21  ;;  %v3571_v21 = vld [vmem:[%s6927_s25 + $0x1b8] sm:$0xff] }
  0x4a   : > { %4839 = vmatpush3.bf16.msra.mxu1 %v4836_v28  ;;  %4817 = vmatprep.subr.bf16.mxu0 %v4816_v33  ;;  %v3534_v28 = vld [vmem:[%s6927_s25 + $0x130] sm:$0xff]  ;;  %v3587_v24 = vld [vmem:[%s6928_s21 + $0x1b8] sm:$0xff]  ;;  %v4952_v25 = vpack.c.bf16 %v3571_v21, %v3570_v20 }
  0x4b   : > { %4841 = vmatprep.subr.bf16.mxu1 %v4840_v35  ;;  %v3607_v21 = vld [vmem:[%s6888_s4 + $0x78] sm:$0xff] }
  0x4d   : > { %4819 = vmatpush3.bf16.msra.mxu0 %v4816_v33  ;;  %v4896_v33 = vpack.c.bf16 %v3535_v29, %v3534_v28  ;;  %v3589_v28 = vld [vmem:[%s6928_s21 + $0x1c8] sm:$0xff] }
  0x4e   : > { %4843 = vmatpush3.bf16.msra.mxu1 %v4840_v35  ;;  %4845 = vmatprep.subr.bf16.mxu0 %v4844_v40 }
  0x4f   : > { %4869 = vmatprep.subr.bf16.mxu1 %v4868_v41 }
  0x50   : > { %4189 = vmatmul.mubr.msk.f32.vlgmr.msra.gmra.mrb[0].mxu0 %vm628_vm1, %v5684_v23 }
  0x51   : > { %4219 = vmatmul.mubr.msk.f32.vlgmr.msra.gmra.mrb[0].mxu1 %vm628_vm1, %v5684_v23  ;;  %4847 = vmatpush3.bf16.msra.mxu0 %v4844_v40  ;;  %v3552_v23 = vld [vmem:[%s6928_s21 + $0x140] sm:$0xff] }
  0x52   : > { %4871 = vmatpush3.bf16.msra.mxu1 %v4868_v41  ;;  %4849 = vmatprep.subr.bf16.mxu0 %v4848_v50  ;;  %v3538_v41 = vld [vmem:[%s6927_s25 + $0x150] sm:$0xff] }
  0x53   : > { %4873 = vmatprep.subr.bf16.mxu1 %v4872_v54  ;;  %4191 = vmatprep.mubr.msk.f32.mxu0 %vm628_vm1, %v5705_v34  ;;  %v4904_v48 = vpack.c.bf16 %v3539_v43, %v3538_v41 }
  0x54   : > { %4221 = vmatprep.mubr.msk.f32.mxu1 %vm628_vm1, %v5705_v34  ;;  %4192 = vmatmul.mubr.msk.f32.gmra.mrb[2].mxu0 %vm628_vm1, %v5729_v46  ;;  %v3551_v34 = vld [vmem:[%s6928_s21 + $0x138] sm:$0xff] }
  0x55   : > { %4851 = vmatpush3.bf16.msra.mxu0 %v4848_v50  ;;  %4222 = vmatmul.mubr.msk.f32.gmra.mrb[2].mxu1 %vm628_vm1, %v5729_v46  ;;  %v4920_v35 = vpack.c.bf16 %v3551_v34, %v3550_v30  ;;  %v3553_v46 = vld [vmem:[%s6928_s21 + $0x148] sm:$0xff]  ;;  %v4928_v50 = vpack.c.bf16 %v3555_v45, %v3554_v44  ;;  %v3574_v34 = vld [vmem:[%s6927_s25 + $0x1d0] sm:$0xff] }
  0x56   : > { %4875 = vmatpush3.bf16.msra.mxu1 %v4872_v54  ;;  %4853 = vmatprep.subr.bf16.mxu0 %v4852_v63  ;;  %v4924_v40 = vpack.c.bf16 %v3553_v46, %v3552_v23  ;;  %v3540_v54 = vld [vmem:[%s6927_s25 + $0x160] sm:$0xff] }
  0x57   : > { %4877 = vmatprep.subr.bf16.mxu1 %v4876_v0  ;;  %4248 = vmatprep.mubr.msk.f32.mxu0 %vm628_vm1, %v1014_v4  ;;  %v4908_v58 = vpack.c.bf16 %v3541_v55, %v3540_v54 }
  0x58   : > { %4278 = vmatprep.mubr.msk.f32.mxu1 %vm628_vm1, %v1014_v4  ;;  %v3580_v4 = vld [vmem:[%s6928_s21 + $0x180] sm:$0xff] }
  0x59   : > { %4855 = vmatpush3.bf16.msra.mxu0 %v4852_v63  ;;  %v3543_v63 = vld [vmem:[%s6927_s25 + $0x178] sm:$0xff] }
  0x5a   : > { %4879 = vmatpush3.bf16.msra.mxu1 %v4876_v0  ;;  %4857 = vmatprep.subr.bf16.mxu0 %v4856_v5  ;;  %v3558_v0 = vld [vmem:[%s6928_s21 + $0x170] sm:$0xff]  ;;  %v4912_v1 = vpack.c.bf16 %v3543_v63, %v3542_v62 }
  0x5b   : > { %4881 = vmatprep.subr.bf16.mxu1 %v4880_v6 }
  0x5d   : > { %4859 = vmatpush3.bf16.msra.mxu0 %v4856_v5  ;;  %v3581_v5 = vld [vmem:[%s6928_s21 + $0x188] sm:$0xff] }
  0x5e   : > { %4883 = vmatpush3.bf16.msra.mxu1 %v4880_v6  ;;  %4861 = vmatprep.subr.bf16.mxu0 %v4860_v11  ;;  %v4940_v6 = vpack.c.bf16 %v3565_v3, %v3564_v2  ;;  %v4964_v7 = vpack.c.bf16 %v3581_v5, %v3580_v4  ;;  %v3603_v4 = vld [vmem:[%s6888_s4 + $0x58] sm:$0xff] }
  0x5f   : > { %4885 = vmatprep.subr.bf16.mxu1 %v4884_v12 }
  0x61   : > { %4863 = vmatpush3.bf16.msra.mxu0 %v4860_v11  ;;  %v3583_v11 = vld [vmem:[%s6928_s21 + $0x198] sm:$0xff] }
  0x62   : > { %4887 = vmatpush3.bf16.msra.mxu1 %v4884_v12  ;;  %4865 = vmatprep.subr.bf16.mxu0 %v4864_v17  ;;  %v4944_v12 = vpack.c.bf16 %v3567_v9, %v3566_v8  ;;  %v4968_v13 = vpack.c.bf16 %v3583_v11, %v3582_v10  ;;  %v3618_v8 = vld [vmem:[%s6889_s5 + $0x60] sm:$0xff] }
  0x63   : > { %4889 = vmatprep.subr.bf16.mxu1 %v4888_v18 }
  0x65   : > { %4867 = vmatpush3.bf16.msra.mxu0 %v4864_v17  ;;  %v3585_v17 = vld [vmem:[%s6928_s21 + $0x1a8] sm:$0xff] }
  0x66   : > { %4891 = vmatpush3.bf16.msra.mxu1 %v4888_v18  ;;  %4893 = vmatprep.subr.bf16.mxu0 %v4892_v26  ;;  %v4948_v18 = vpack.c.bf16 %v3569_v15, %v3568_v14  ;;  %v4972_v19 = vpack.c.bf16 %v3585_v17, %v3584_v16  ;;  %v3606_v14 = vld [vmem:[%s6888_s4 + $0x70] sm:$0xff]  ;;  %v3619_v15 = vld [vmem:[%s6889_s5 + $0x68] sm:$0xff] }
  0x67   : > { %4917 = vmatprep.subr.bf16.mxu1 %v4916_v27  ;;  %v3620_v16 = vld [vmem:[%s6889_s5 + $0x70] sm:$0xff]  ;;  %v1686_v17 = vld [vmem:[%s6891_s7 + $0x8] sm:$0x3f] }
  0x68   : > { %4249 = vmatmul.mubr.msk.f32.vlgmr.msra.gmra.mrb[0].mxu0 %vm628_vm1, %v1016_v32  ;;  %v5032_v20 = vpack.c.bf16 %v3620_v16, %v3619_v15  ;;  %v1874_v15 = vld [vmem:[%s6889_s5 + $0x30] sm:$0xff]  ;;  %v1875_v16 = vld [vmem:[%s6889_s5 + $0x38] sm:$0xff] }
  0x69   : > { %4279 = vmatmul.mubr.msk.f32.vlgmr.msra.gmra.mrb[0].mxu1 %vm628_vm1, %v1016_v32  ;;  %4895 = vmatpush3.bf16.msra.mxu0 %v4892_v26  ;;  %v3590_v32 = vld [vmem:[%s6928_s21 + $0x1d0] sm:$0xff] }
  0x6a   : > { %4919 = vmatpush3.bf16.msra.mxu1 %v4916_v27  ;;  %4897 = vmatprep.subr.bf16.mxu0 %v4896_v33  ;;  %v3572_v27 = vld [vmem:[%s6927_s25 + $0x1c0] sm:$0xff] }
  0x6b   : > { %4921 = vmatprep.subr.bf16.mxu1 %v4920_v35  ;;  %4251 = vmatprep.mubr.msk.f32.mxu0 %vm628_vm1, %v1018_v38 }
  0x6c   : > { %4281 = vmatprep.mubr.msk.f32.mxu1 %vm628_vm1, %v1018_v38  ;;  %4252 = vmatmul.mubr.msk.f32.gmra.mrb[2].mxu0 %vm628_vm1, %v1017_v31 }
  0x6d   : > { %4899 = vmatpush3.bf16.msra.mxu0 %v4896_v33  ;;  %4282 = vmatmul.mubr.msk.f32.gmra.mrb[2].mxu1 %vm628_vm1, %v1017_v31  ;;  %v3575_v31 = vld [vmem:[%s6927_s25 + $0x1d8] sm:$0xff] }
  0x6e   : > { %4923 = vmatpush3.bf16.msra.mxu1 %v4920_v35  ;;  %4901 = vmatprep.subr.bf16.mxu0 %v4900_v39  ;;  %v4960_v33 = vpack.c.bf16 %v3575_v31, %v3574_v34  ;;  %v3611_v31 = vld [vmem:[%s6888_s4 + $0x98] sm:$0xff] }
  0x6f   : > { %4925 = vmatprep.subr.bf16.mxu1 %v4924_v40  ;;  %4308 = vmatprep.mubr.msk.f32.mxu0 %vm628_vm1, %v5719_v42 }
  0x70   : > { %4338 = vmatprep.mubr.msk.f32.mxu1 %vm628_vm1, %v5719_v42  ;;  %v3559_v42 = vld [vmem:[%s6928_s21 + $0x178] sm:$0xff] }
  0x71   : > { %4903 = vmatpush3.bf16.msra.mxu0 %v4900_v39  ;;  %v4936_v22 = vpack.c.bf16 %v3559_v42, %v3558_v0 }
  0x72   : > { %4927 = vmatpush3.bf16.msra.mxu1 %v4924_v40  ;;  %4905 = vmatprep.subr.bf16.mxu0 %v4904_v48 }
  0x73   : > { %4929 = vmatprep.subr.bf16.mxu1 %v4928_v50 }
  0x75   : > { %4907 = vmatpush3.bf16.msra.mxu0 %v4904_v48 }
  0x76   : > { %4931 = vmatpush3.bf16.msra.mxu1 %v4928_v50  ;;  %4909 = vmatprep.subr.bf16.mxu0 %v4908_v58 }
  0x77   : > { %4933 = vmatprep.subr.bf16.mxu1 %v4932_v61 }
  0x79   : > { %4911 = vmatpush3.bf16.msra.mxu0 %v4908_v58 }
  0x7a   : > { %4935 = vmatpush3.bf16.msra.mxu1 %v4932_v61  ;;  %4913 = vmatprep.subr.bf16.mxu0 %v4912_v1 }
  0x7b   : > { %4937 = vmatprep.subr.bf16.mxu1 %v4936_v22 }
  0x7d   : > { %4915 = vmatpush3.bf16.msra.mxu0 %v4912_v1 }
  0x7e   : > { %4939 = vmatpush3.bf16.msra.mxu1 %v4936_v22  ;;  %4941 = vmatprep.subr.bf16.mxu0 %v4940_v6 }
  0x7f   : > { %4965 = vmatprep.subr.bf16.mxu1 %v4964_v7 }
  0x80   : > { %4309 = vmatmul.mubr.msk.f32.vlgmr.msra.gmra.mrb[0].mxu0 %vm628_vm1, %v5732_v47 }
  0x81   : > { %4339 = vmatmul.mubr.msk.f32.vlgmr.msra.gmra.mrb[0].mxu1 %vm628_vm1, %v5732_v47  ;;  %4943 = vmatpush3.bf16.msra.mxu0 %v4940_v6  ;;  %v3586_v47 = vld [vmem:[%s6928_s21 + $0x1b0] sm:$0xff]  ;;  %v3604_v6 = vld [vmem:[%s6888_s4 + $0x60] sm:$0xff] }
  0x82   : > { %4967 = vmatpush3.bf16.msra.mxu1 %v4964_v7  ;;  %4945 = vmatprep.subr.bf16.mxu0 %v4944_v12  ;;  %v4976_v26 = vpack.c.bf16 %v3587_v24, %v3586_v47  ;;  %v3617_v7 = vld [vmem:[%s6889_s5 + $0x58] sm:$0xff]  ;;  %v5008_v11 = vpack.c.bf16 %v3604_v6, %v3603_v4  ;;  %v3608_v47 = vld [vmem:[%s6888_s4 + $0x80] sm:$0xff] }
  0x83   : > { %4969 = vmatprep.subr.bf16.mxu1 %v4968_v13  ;;  %4311 = vmatprep.mubr.msk.f32.mxu0 %vm628_vm1, %v5761_v59  ;;  %v3621_v24 = vld [vmem:[%s6889_s5 + $0x78] sm:$0xff] }
  0x84   : > { %4341 = vmatprep.mubr.msk.f32.mxu1 %vm628_vm1, %v5761_v59  ;;  %4312 = vmatmul.mubr.msk.f32.gmra.mrb[2].mxu0 %vm628_vm1, %v5736_v49  ;;  %v3573_v59 = vld [vmem:[%s6927_s25 + $0x1c8] sm:$0xff] }
  0x85   : > { %4947 = vmatpush3.bf16.msra.mxu0 %v4944_v12  ;;  %4342 = vmatmul.mubr.msk.f32.gmra.mrb[2].mxu1 %vm628_vm1, %v5736_v49  ;;  %v3588_v49 = vld [vmem:[%s6928_s21 + $0x1c0] sm:$0xff]  ;;  %v4956_v29 = vpack.c.bf16 %v3573_v59, %v3572_v27  ;;  %v5028_v12 = vpack.c.bf16 %v3618_v8, %v3617_v7  ;;  %v3609_v59 = vld [vmem:[%s6888_s4 + $0x88] sm:$0xff] }
  0x86   : > { %4971 = vmatpush3.bf16.msra.mxu1 %v4968_v13  ;;  %4949 = vmatprep.subr.bf16.mxu0 %v4948_v18  ;;  %v4980_v30 = vpack.c.bf16 %v3589_v28, %v3588_v49  ;;  %v3605_v13 = vld [vmem:[%s6888_s4 + $0x68] sm:$0xff]  ;;  %v3610_v49 = vld [vmem:[%s6888_s4 + $0x90] sm:$0xff] }
  0x87   : > { %4973 = vmatprep.subr.bf16.mxu1 %v4972_v19  ;;  %4368 = vmatprep.mubr.msk.f32.mxu0 %vm628_vm1, %v5739_v51  ;;  %v3623_v28 = vld [vmem:[%s6889_s5 + $0x88] sm:$0xff] }
  0x88   : > { %4398 = vmatprep.mubr.msk.f32.mxu1 %vm628_vm1, %v5739_v51  ;;  %v3591_v51 = vld [vmem:[%s6928_s21 + $0x1d8] sm:$0xff]  ;;  %v1862_v8 = vld [vmem:[%s6888_s4 + $0x28] sm:$0xff] }
  0x89   : > { %4951 = vmatpush3.bf16.msra.mxu0 %v4948_v18  ;;  %v4984_v35 = vpack.c.bf16 %v3591_v51, %v3590_v32  ;;  %v1773_v18 = vld [vmem:[%s6892_s8 + $0x8] sm:$0x3f]  ;;  %v3612_v32 = vld [vmem:[%s6888_s4 + $0xa0] sm:$0xff]  ;;  %v3625_v51 = vld [vmem:[%s6889_s5 + $0x98] sm:$0xff] }
  0x8a   : > { %4975 = vmatpush3.bf16.msra.mxu1 %v4972_v19  ;;  %4953 = vmatprep.subr.bf16.mxu0 %v4952_v25  ;;  %v5012_v19 = vpack.c.bf16 %v3606_v14, %v3605_v13  ;;  %v1863_v13 = vld [vmem:[%s6888_s4 + $0x30] sm:$0xff]  ;;  %v1864_v14 = vld [vmem:[%s6888_s4 + $0x38] sm:$0xff] }
  0x8b   : > { %4977 = vmatprep.subr.bf16.mxu1 %v4976_v26 }
  0x8d   : > { %4955 = vmatpush3.bf16.msra.mxu0 %v4952_v25  ;;  %v3622_v25 = vld [vmem:[%s6889_s5 + $0x80] sm:$0xff] }
  0x8e   : > { %4979 = vmatpush3.bf16.msra.mxu1 %v4976_v26  ;;  %4957 = vmatprep.subr.bf16.mxu0 %v4956_v29  ;;  %v5016_v26 = vpack.c.bf16 %v3608_v47, %v3607_v21  ;;  %v5036_v27 = vpack.c.bf16 %v3622_v25, %v3621_v24  ;;  %v1876_v21 = vld [vmem:[%s6889_s5 + $0x40] sm:$0xff]  ;;  %v1877_v47 = vld [vmem:[%s6889_s5 + $0x48] sm:$0xff] }
  0x8f   : > { %4981 = vmatprep.subr.bf16.mxu1 %v4980_v30  ;;  %v5084_v25 = vpack.c.bf16 %v1877_v47, %v1876_v21  ;;  %v3673_v47 = vld [vmem:[%s6888_s4 + $0x148] sm:$0xff] }
  0x91   : > { %4959 = vmatpush3.bf16.msra.mxu0 %v4956_v29  ;;  %v3624_v29 = vld [vmem:[%s6889_s5 + $0x90] sm:$0xff] }
  0x92   : > { %4983 = vmatpush3.bf16.msra.mxu1 %v4980_v30  ;;  %4961 = vmatprep.subr.bf16.mxu0 %v4960_v33  ;;  %v5020_v30 = vpack.c.bf16 %v3610_v49, %v3609_v59  ;;  %v5040_v34 = vpack.c.bf16 %v3624_v29, %v3623_v28  ;;  %v3637_v59 = vld [vmem:[%s6888_s4 + $0xb0] sm:$0xff]  ;;  %v3638_v49 = vld [vmem:[%s6888_s4 + $0xb8] sm:$0xff] }
  0x93   : > { %4985 = vmatprep.subr.bf16.mxu1 %v4984_v35  ;;  %v3651_v28 = vld [vmem:[%s6889_s5 + $0xb0] sm:$0xff]  ;;  %v3652_v29 = vld [vmem:[%s6889_s5 + $0xb8] sm:$0xff] }
  0x95   : > { %4963 = vmatpush3.bf16.msra.mxu0 %v4960_v33  ;;  %v5024_v33 = vpack.c.bf16 %v3612_v32, %v3611_v31  ;;  %v5108_v31 = vpack.c.bf16 %v3652_v29, %v3651_v28  ;;  %v3640_v32 = vld [vmem:[%s6888_s4 + $0xc8] sm:$0xff]  ;;  %v3689_v28 = vld [vmem:[%s6889_s5 + $0x158] sm:$0xf]  ;;  %v3693_v29 = vld [vmem:[%s6888_s4 + $0x160] sm:$0xff] }
  0x96   : > { %4987 = vmatpush3.bf16.msra.mxu1 %v4984_v35  ;;  %v3626_v35 = vld [vmem:[%s6889_s5 + $0xa0] sm:$0xff] }
  0x98   : > { %4369 = vmatmul.mubr.msk.f32.vlgmr.msra.gmra.mrb[0].mxu0 %vm628_vm1, %v5742_v52 }
  0x99   : > { %4399 = vmatmul.mubr.msk.f32.vlgmr.msra.gmra.mrb[0].mxu1 %vm628_vm1, %v5742_v52  ;;  %4371 = vmatprep.mubr.msk.f32.mxu0 %vm628_vm1, %v5765_v60  ;;  %v1772_v52 = vld [vmem:[%s6892_s8] sm:$0xff] }
  0x9a   : > { %4401 = vmatprep.mubr.msk.f32.mxu1 %vm628_vm1, %v5765_v60  ;;  %v3596_v60 = vld [vmem:[%s6887_s3] ss:$0 sm:$0xff] }
  0x9c   : > { %4372 = vmatmul.mubr.msk.f32.gmra.mrb[2].mxu0 %vm628_vm1, %v5745_v53 }
  0x9d   : > { %4402 = vmatmul.mubr.msk.f32.gmra.mrb[2].mxu1 %vm628_vm1, %v5745_v53  ;;  %4412 = vmatprep.mubr.msk.f32.mxu0 %vm1687_vm5, %v1685_v36  ;;  %v5044_v36 = vpack.c.bf16 %v3626_v35, %v3625_v51  ;;  %v3653_v51 = vld [vmem:[%s6889_s5 + $0xc0] sm:$0xff]  ;;  %vm2990_vm1 = vcmask 654336  }
  0x9e   : > { %4423 = vmatprep.mubr.msk.f32.mxu1 %vm1687_vm5, %v1772_v52  ;;  %v3613_v52 = vld [vmem:[%s6888_s4 + $0xa8] sm:$0xf] }
 0x16b   : > { %v4370_v37 = vpop.f32.mrb[0].mxu0 }
 0x16c   : > { %v1666_v23 = vadd.f32 %v4370_v37, %v3596_v60  ;;  %v4400_v53 = vpop.f32.mrb[0].mxu1  ;;  %v1533_v46 = vpop.f32.mrb[1].mxu0  ;;  %v1857_v37 = vld [vmem:[%s6888_s4] sm:$0xff] }
 0x16d   : > { %v1674_v38 = vadd.f32 %v4400_v53, %v3596_v60  ;;  %v1665_v39 = vadd.f32 %v3596_v60, %v1533_v46  ;;  %v1631_v40 = vpop.f32.mrb[1].mxu1  ;;  %v1868_v53 = vld [vmem:[%s6889_s5] sm:$0xff] }
 0x16e   : > { %v1670_v41 = vmax.f32 %v1666_v23, 0.0  ;;  %v1673_v43 = vadd.f32 %v3596_v60, %v1631_v40  ;;  %v1858_v23 = vld [vmem:[%s6888_s4 + $0x8] sm:$0xff] }
 0x16f   : > { %v1678_v44 = vmax.f32 %v1674_v38, 0.0  ;;  %v1669_v45 = vmax.f32 %v1665_v39, 0.0  ;;  %v4373_v48 = vpop.f32.mrb[2].mxu0  ;;  %v5048_v46 = vpack.c.bf16 %v1858_v23, %v1857_v37  ;;  %v1869_v38 = vld [vmem:[%s6889_s5 + $0x8] sm:$0xff]  ;;  %v3655_v37 = vld [vmem:[%s6889_s5 + $0xd0] sm:$0xff]  ;;  %v3656_v23 = vld [vmem:[%s6889_s5 + $0xd8] sm:$0xff] }
 0x170   : > { %v1677_v50 = vmax.f32 %v1673_v43, 0.0  ;;  %v1668_v54 = vadd.f32 %v4373_v48, %v3596_v60  ;;  %v4403_v55 = vpop.f32.mrb[2].mxu1  ;;  %v1543_v56 = vpop.f32.mrb[3].mxu0  ;;  %v5068_v39 = vpack.c.bf16 %v1869_v38, %v1868_v53  ;;  %v3643_v38 = vld [vmem:[%s6888_s4 + $0xe0] sm:$0xff] }
 0x171   : > { %v1682_v57 = vmax.f32 %v1670_v41, %v1678_v44  ;;  %v1676_v58 = vadd.f32 %v4403_v55, %v3596_v60  ;;  %v1667_v61 = vadd.f32 %v3596_v60, %v1543_v56  ;;  %v1641_v62 = vpop.f32.mrb[3].mxu1  ;;  %v1860_v55 = vld [vmem:[%s6888_s4 + $0x18] sm:$0xff] }
 0x172   : > { %v1681_v63 = vmax.f32 %v1669_v45, %v1677_v50  ;;  %v1672_v0 = vmax.f32 %v1668_v54, 0.0  ;;  %v1675_v42 = vadd.f32 %v3596_v60, %v1641_v62  ;;  %v3627_v60 = vld [vmem:[%s6889_s5 + $0xa8] sm:$0xf]  ;;  %v1859_v54 = vld [vmem:[%s6888_s4 + $0x10] sm:$0xff] }
 0x173   : > { %v1680_v1 = vmax.f32 %v1676_v58, 0.0  ;;  %v1671_v22 = vmax.f32 %v1667_v61, 0.0  ;;  %v1870_v62 = vld [vmem:[%s6889_s5 + $0x10] sm:$0xff]  ;;  %v5052_v6 = vpack.c.bf16 %v1860_v55, %v1859_v54  ;;  %v3660_v54 = vld [vmem:[%s6889_s5 + $0xf8] sm:$0xff] }
 0x174   : > { %v4988_v2 = vpack.c.bf16 %v1682_v57, %v1681_v63  ;;  %v1679_v3 = vmax.f32 %v1675_v42, 0.0  ;;  %v1871_v63 = vld [vmem:[%s6889_s5 + $0x18] sm:$0xff] }
 0x175   : > { %v1684_v5 = vmax.f32 %v1672_v0, %v1680_v1  ;;  %v5072_v7 = vpack.c.bf16 %v1871_v63, %v1870_v62  ;;  %v3647_v62 = vld [vmem:[%s6888_s4 + $0x100] sm:$0xf] }
 0x176   : > { %v1683_v9 = vmax.f32 %v1671_v22, %v1679_v3  ;;  %4989 = vmatprep.subr.bf16.mxu0 %v4988_v2  ;;  %4999 = vmatprep.subr.bf16.mxu1 %v4988_v2  ;;  %v3661_v63 = vld [vmem:[%s6889_s5 + $0x100] sm:$0xf] }
 0x177   : > { %4991 = vmatpush3.bf16.msra.mxu0 %v4988_v2  ;;  %5001 = vmatpush3.bf16.msra.mxu1 %v4988_v2  ;;  %v1861_v2 = vld [vmem:[%s6888_s4 + $0x20] sm:$0xff] }
 0x178   : > { %v4992_v10 = vpack.c.bf16 %v1684_v5, %v1683_v9  ;;  %v1872_v9 = vld [vmem:[%s6889_s5 + $0x20] sm:$0xff] }
 0x17a   : > { %4994 = vmatprep.subr.msk.bf16.mxu0 %vm4993_vm7, %v4992_v10  ;;  %5004 = vmatprep.subr.msk.bf16.mxu1 %vm4993_vm7, %v4992_v10 }
 0x17b   : > { %4997 = vmatpush3.bf16.msk.msra.mxu0 %vm4993_vm7, %v4992_v10  ;;  %5007 = vmatpush3.bf16.msk.msra.mxu1 %vm4993_vm7, %v4992_v10  ;;  %v1873_v10 = vld [vmem:[%s6889_s5 + $0x28] sm:$0xff] }
 0x17c   : > { %5009 = vmatprep.subr.bf16.mxu0 %v5008_v11  ;;  %5029 = vmatprep.subr.bf16.mxu1 %v5028_v12 }
 0x17e   : > { %4413 = vmatmul.mubr.msk.f32.vlgmr.msra.gmra.mrb[4].mxu0 %vm1687_vm5, %v1686_v17  ;;  %4424 = vmatmul.mubr.msk.f32.vlgmr.msra.gmra.mrb[4].mxu1 %vm1687_vm5, %v1773_v18  ;;  %v5060_v17 = vpack.c.bf16 %v1864_v14, %v1863_v13  ;;  %v5080_v18 = vpack.c.bf16 %v1875_v16, %v1874_v15  ;;  %v3683_v14 = vld [vmem:[%s6889_s5 + $0x128] sm:$0xff]  ;;  %v3684_v15 = vld [vmem:[%s6889_s5 + $0x130] sm:$0xff] }
 0x17f   : > { %5011 = vmatpush3.bf16.msra.mxu0 %v5008_v11  ;;  %5031 = vmatpush3.bf16.msra.mxu1 %v5028_v12  ;;  %v5056_v11 = vpack.c.bf16 %v1862_v8, %v1861_v2  ;;  %v5076_v12 = vpack.c.bf16 %v1873_v10, %v1872_v9  ;;  %v3681_v8 = vld [vmem:[%s6889_s5 + $0x118] sm:$0xff]  ;;  %v3682_v9 = vld [vmem:[%s6889_s5 + $0x120] sm:$0xff] }
 0x180   : > { %5013 = vmatprep.subr.bf16.mxu0 %v5012_v19  ;;  %5033 = vmatprep.subr.bf16.mxu1 %v5032_v20  ;;  %v5152_v13 = vpack.c.bf16 %v3682_v9, %v3681_v8 }
 0x183   : > { %5015 = vmatpush3.bf16.msra.mxu0 %v5012_v19  ;;  %5035 = vmatpush3.bf16.msra.mxu1 %v5032_v20  ;;  %v1865_v19 = vld [vmem:[%s6888_s4 + $0x40] sm:$0xff]  ;;  %v1866_v20 = vld [vmem:[%s6888_s4 + $0x48] sm:$0xff] }
 0x184   : > { %5017 = vmatprep.subr.bf16.mxu0 %v5016_v26  ;;  %5037 = vmatprep.subr.bf16.mxu1 %v5036_v27  ;;  %v5064_v24 = vpack.c.bf16 %v1866_v20, %v1865_v19  ;;  %v3685_v19 = vld [vmem:[%s6889_s5 + $0x138] sm:$0xff]  ;;  %v3686_v20 = vld [vmem:[%s6889_s5 + $0x140] sm:$0xff] }
 0x185   : > { %v5160_v21 = vpack.c.bf16 %v3686_v20, %v3685_v19  ;;  %v3030_v19 = vld [vmem:[%s6896_s12 + $0x100] sm:$0xff]  ;;  %v3031_v20 = vld [vmem:[%s6896_s12 + $0x108] sm:$0xff] }
 0x187   : > { %5019 = vmatpush3.bf16.msra.mxu0 %v5016_v26  ;;  %5039 = vmatpush3.bf16.msra.mxu1 %v5036_v27  ;;  %v1867_v26 = vld [vmem:[%s6888_s4 + $0x50] sm:$0xf] }
 0x188   : > { %5021 = vmatprep.subr.bf16.mxu0 %v5020_v30  ;;  %5041 = vmatprep.subr.bf16.mxu1 %v5040_v34  ;;  %v1878_v27 = vld [vmem:[%s6889_s5 + $0x50] sm:$0xf] }
 0x18b   : > { %5023 = vmatpush3.bf16.msra.mxu0 %v5020_v30  ;;  %5043 = vmatpush3.bf16.msra.mxu1 %v5040_v34  ;;  %v3639_v30 = vld [vmem:[%s6888_s4 + $0xc0] sm:$0xff]  ;;  %v5088_v34 = vpack.c.bf16 %v3638_v49, %v3637_v59  ;;  %v3675_v49 = vld [vmem:[%s6888_s4 + $0x158] sm:$0xf] }
 0x18c   : > { %5025 = vmatprep.subr.bf16.mxu0 %v5024_v33  ;;  %5045 = vmatprep.subr.bf16.mxu1 %v5044_v36  ;;  %v5092_v35 = vpack.c.bf16 %v3640_v32, %v3639_v30  ;;  %v3694_v30 = vld [vmem:[%s6888_s4 + $0x168] sm:$0xff] }
 0x18d   : > { %v5168_v32 = vpack.c.bf16 %v3694_v30, %v3693_v29  ;;  %v3034_v29 = vld [vmem:[%s6896_s12 + $0x120] sm:$0xff]  ;;  %v3016_v30 = vld [vmem:[%s6896_s12 + $0x90] sm:$0xff] }
 0x18f   : > { %5027 = vmatpush3.bf16.msra.mxu0 %v5024_v33  ;;  %5047 = vmatpush3.bf16.msra.mxu1 %v5044_v36  ;;  %v3654_v33 = vld [vmem:[%s6889_s5 + $0xc8] sm:$0xff] }
 0x190   : > { %4446 = vmatprep.subr.msk.mxu0 %vm1451_vm3, %v3613_v52  ;;  %4471 = vmatprep.subr.msk.mxu1 %vm1451_vm3, %v3627_v60  ;;  %v5112_v36 = vpack.c.bf16 %v3654_v33, %v3653_v51  ;;  %v3695_v51 = vld [vmem:[%s6888_s4 + $0x170] sm:$0xff]  ;;  %v3696_v33 = vld [vmem:[%s6888_s4 + $0x178] sm:$0xff] }
 0x193   : > { %4447 = vmatpush3.msk.msra.mxu0 %vm1451_vm3, %v3613_v52  ;;  %4472 = vmatpush3.msk.msra.mxu1 %vm1451_vm3, %v3627_v60  ;;  %v3641_v52 = vld [vmem:[%s6888_s4 + $0xd0] sm:$0xff]  ;;  %v3642_v60 = vld [vmem:[%s6888_s4 + $0xd8] sm:$0xff] }
 0x194   : > { %5049 = vmatprep.subr.bf16.mxu0 %v5048_v46  ;;  %5069 = vmatprep.subr.bf16.mxu1 %v5068_v39  ;;  %v5096_v53 = vpack.c.bf16 %v3642_v60, %v3641_v52  ;;  %v3710_v52 = vld [vmem:[%s6889_s5 + $0x178] sm:$0xff]  ;;  %v5172_v60 = vpack.c.bf16 %v3696_v33, %v3695_v51  ;;  %v3000_v51 = vld [vmem:[%s6896_s12 + $0x10] sm:$0xff] }
 0x195   : > { %v3001_v33 = vld [vmem:[%s6896_s12 + $0x18] sm:$0xff] }
 0x251   : > { %v4414_v40 = vpop.f32.mrb[4].mxu0  ;;  %v4425_v41 = vpop.f32.mrb[4].mxu1 }
 0x252   : > { %v6225_v43 = vmax.f32 %v4414_v40, %v4425_v41  ;;  %v1763_v44 = vpop.f32.mrb[5].mxu0  ;;  %v1846_v45 = vpop.f32.mrb[5].mxu1  ;;  %v3657_v40 = vld [vmem:[%s6889_s5 + $0xe0] sm:$0xff]  ;;  %v3658_v41 = vld [vmem:[%s6889_s5 + $0xe8] sm:$0xff] }
 0x253   : > { %v1855_v48 = vmax.f32 %v1763_v44, %v1846_v45  ;;  %v5120_v44 = vpack.c.bf16 %v3658_v41, %v3657_v40  ;;  %v3645_v45 = vld [vmem:[%s6888_s4 + $0xf0] sm:$0xff]  ;;  %v3700_v41 = vld [vmem:[%s6888_s4 + $0x198] sm:$0xff] }
 0x254   : > { %v1894_v50 = vrot.slane %v6225_v43, 1  ;;  %v6235_v56 = vrot.slane %v6225_v43, 2  ;;  %v6238_v57 = vrot.slane %v6225_v43, 3  ;;  %v6241_v58 = vrot.slane %v6225_v43, 4  ;;  %v3699_v40 = vld [vmem:[%s6888_s4 + $0x190] sm:$0xff] }
 0x255   : > { %v1893_v61 = vrot.slane %v1855_v48, 1  ;;  %v2241_v0 = vrot.slane %v1855_v48, 2  ;;  %v2432_v42 = vrot.slane %v1855_v48, 3  ;;  %v2623_v1 = vrot.slane %v1855_v48, 4 }
 0x257   : > { %v1895_v22 = vsel %vm620_vm0, %v1893_v61, %v1894_v50  ;;  %v6255_v3 = vsel %vm1011_vm4, %v2241_v0, %v6235_v56  ;;  %v6259_v4 = vsel %vm1231_vm2, %v2432_v42, %v6238_v57  ;;  %v6263_v5 = vsel %vm1451_vm3, %v2623_v1, %v6241_v58  ;;  %v3665_v0 = vld [vmem:[%s6888_s4 + $0x108] sm:$0xff]  ;;  %v3666_v42 = vld [vmem:[%s6888_s4 + $0x110] sm:$0xff] }
 0x258   : > { %4448 = vmatprep.mubr.msk.f32.mxu0 %vm1896_vm8, %v1895_v22  ;;  %4473 = vmatprep.mubr.msk.f32.mxu1 %vm1896_vm8, %v1895_v22  ;;  %v3679_v1 = vld [vmem:[%s6889_s5 + $0x108] sm:$0xff]  ;;  %v3680_v22 = vld [vmem:[%s6889_s5 + $0x110] sm:$0xff]  ;;  %v5128_v2 = vpack.c.bf16 %v3666_v42, %v3665_v0  ;;  %v5475_v42 = vmov 0.0|0.0   ;;  %vm2994_vm0 = vcmask 916480   ;;  %vm3209_vm2 = vcmask 982016  }
 0x259   : > { %4449 = vmatmul.mubr.msk.f32.vlgmr.msra.gmra.mrb[6].mxu0 %vm1896_vm8, %v1894_v50  ;;  %4474 = vmatmul.mubr.msk.f32.vlgmr.msra.gmra.mrb[6].mxu1 %vm1896_vm8, %v1894_v50  ;;  %v3659_v50 = vld [vmem:[%s6889_s5 + $0xf0] sm:$0xff]  ;;  %vm3372_vm4 = vcmask 73728  }
 0x25a   : > { %5051 = vmatpush3.bf16.msra.mxu0 %v5048_v46  ;;  %5071 = vmatpush3.bf16.msra.mxu1 %v5068_v39  ;;  %v5116_v46 = vpack.c.bf16 %v3656_v23, %v3655_v37  ;;  %v3644_v39 = vld [vmem:[%s6888_s4 + $0xe8] sm:$0xff]  ;;  %v5124_v61 = vpack.c.bf16 %v3660_v54, %v3659_v50  ;;  %v3697_v37 = vld [vmem:[%s6888_s4 + $0x180] sm:$0xff]  ;;  %v3717_v0 = vld [vmem:[%s6889_s5 + $0x1b0] sm:$0xf] }
 0x25b   : > { %4498 = vmatprep.mubr.msk.f32.mxu0 %vm1896_vm8, %v1855_v48  ;;  %4523 = vmatprep.mubr.msk.f32.mxu1 %vm1896_vm8, %v1855_v48  ;;  %v3646_v48 = vld [vmem:[%s6888_s4 + $0xf8] sm:$0xff]  ;;  %v3698_v23 = vld [vmem:[%s6888_s4 + $0x188] sm:$0xff]  ;;  %v3715_v54 = vld [vmem:[%s6889_s5 + $0x1a0] sm:$0xff] }
 0x25c   : > { %5053 = vmatprep.subr.bf16.mxu0 %v5052_v6  ;;  %5073 = vmatprep.subr.bf16.mxu1 %v5072_v7  ;;  %v5104_v55 = vpack.c.bf16 %v3646_v48, %v3645_v45  ;;  %v3701_v48 = vld [vmem:[%s6888_s4 + $0x1a0] sm:$0xff]  ;;  %v3702_v50 = vld [vmem:[%s6888_s4 + $0x1a8] sm:$0xff] }
 0x25e   : > { %5055 = vmatpush3.bf16.msra.mxu0 %v5052_v6  ;;  %5075 = vmatpush3.bf16.msra.mxu1 %v5072_v7  ;;  %v3668_v6 = vld [vmem:[%s6888_s4 + $0x120] sm:$0xff]  ;;  %v5148_v7 = vpack.c.bf16 %v3680_v22, %v3679_v1  ;;  %v5477_v1 = vmov 0.0  }
 0x25f   : > { %5057 = vmatprep.subr.bf16.mxu0 %v5056_v11  ;;  %5077 = vmatprep.subr.bf16.mxu1 %v5076_v12  ;;  %v3721_v22 = vld [vmem:[%s6890_s6] ss:$0 sm:$0xff] }
 0x262   : > { %5059 = vmatpush3.bf16.msra.mxu0 %v5056_v11  ;;  %5079 = vmatpush3.bf16.msra.mxu1 %v5076_v12  ;;  %v3669_v11 = vld [vmem:[%s6888_s4 + $0x128] sm:$0xff]  ;;  %v3670_v12 = vld [vmem:[%s6888_s4 + $0x130] sm:$0xff] }
 0x263   : > { %5061 = vmatprep.subr.bf16.mxu0 %v5060_v17  ;;  %5081 = vmatprep.subr.bf16.mxu1 %v5080_v18  ;;  %v5136_v16 = vpack.c.bf16 %v3670_v12, %v3669_v11 }
 0x266   : > { %5063 = vmatpush3.bf16.msra.mxu0 %v5060_v17  ;;  %5083 = vmatpush3.bf16.msra.mxu1 %v5080_v18  ;;  %v3671_v17 = vld [vmem:[%s6888_s4 + $0x138] sm:$0xff]  ;;  %v3672_v18 = vld [vmem:[%s6888_s4 + $0x140] sm:$0xff] }
 0x267   : > { %5065 = vmatprep.subr.bf16.mxu0 %v5064_v24  ;;  %5085 = vmatprep.subr.bf16.mxu1 %v5084_v25 }
 0x26a   : > { %5067 = vmatpush3.bf16.msra.mxu0 %v5064_v24  ;;  %5087 = vmatpush3.bf16.msra.mxu1 %v5084_v25  ;;  %v3674_v24 = vld [vmem:[%s6888_s4 + $0x150] sm:$0xff]  ;;  %v3687_v25 = vld [vmem:[%s6889_s5 + $0x148] sm:$0xff] }
 0x26b   : > { %4496 = vmatprep.subr.msk.mxu0 %vm1451_vm3, %v1867_v26  ;;  %4521 = vmatprep.subr.msk.mxu1 %vm1451_vm3, %v1878_v27 }
 0x26e   : > { %4497 = vmatpush3.msk.msra.mxu0 %vm1451_vm3, %v1867_v26  ;;  %4522 = vmatpush3.msk.msra.mxu1 %vm1451_vm3, %v1878_v27  ;;  %v3688_v26 = vld [vmem:[%s6889_s5 + $0x150] sm:$0xff]  ;;  %v5144_v27 = vpack.c.bf16 %v3674_v24, %v3673_v47  ;;  %v3033_v47 = vld [vmem:[%s6896_s12 + $0x118] sm:$0xff]  ;;  %v3014_v24 = vld [vmem:[%s6896_s12 + $0x80] sm:$0xff] }
 0x26f   : > { %4499 = vmatmul.mubr.msk.f32.vlgmr.msra.gmra.mrb[6].mxu0 %vm1896_vm8, %v6225_v43  ;;  %4524 = vmatmul.mubr.msk.f32.vlgmr.msra.gmra.mrb[6].mxu1 %vm1896_vm8, %v6225_v43  ;;  %v5100_v43 = vpack.c.bf16 %v3644_v39, %v3643_v38  ;;  %v5164_v59 = vpack.c.bf16 %v3688_v26, %v3687_v25  ;;  %v3712_v38 = vld [vmem:[%s6889_s5 + $0x188] sm:$0xff]  ;;  %v5176_v39 = vpack.c.bf16 %v3698_v23, %v3697_v37  ;;  %v3002_v37 = vld [vmem:[%s6896_s12 + $0x20] sm:$0xff] }
 0x270   : > { %5089 = vmatprep.subr.bf16.mxu0 %v5088_v34  ;;  %5109 = vmatprep.subr.bf16.mxu1 %v5108_v31  ;;  %v3015_v25 = vld [vmem:[%s6896_s12 + $0x88] sm:$0xff] }
 0x271   : > { %5091 = vmatpush3.bf16.msra.mxu0 %v5088_v34  ;;  %4548 = vmatprep.mubr.msk.f32.mxu0 %vm1896_vm8, %v6255_v3  ;;  %v3707_v34 = vld [vmem:[%s6889_s5 + $0x160] sm:$0xff]  ;;  %v5216_v26 = vpack.c.bf16 %v3015_v25, %v3014_v24  ;;  %v3003_v23 = vld [vmem:[%s6896_s12 + $0x28] sm:$0xff]  ;;  %v3028_v25 = vld [vmem:[%s6896_s12 + $0xf0] sm:$0xff] }
 0x272   : > { %5111 = vmatpush3.bf16.msra.mxu1 %v5108_v31  ;;  %4573 = vmatprep.mubr.msk.f32.mxu1 %vm1896_vm8, %v6255_v3  ;;  %v3667_v3 = vld [vmem:[%s6888_s4 + $0x118] sm:$0xff]  ;;  %v3708_v31 = vld [vmem:[%s6889_s5 + $0x168] sm:$0xff] }
 0x273   : > { %5093 = vmatprep.subr.bf16.mxu0 %v5092_v35  ;;  %5113 = vmatprep.subr.bf16.mxu1 %v5112_v36  ;;  %v5132_v10 = vpack.c.bf16 %v3668_v6, %v3667_v3  ;;  %v3047_v24 = vld [vmem:[%s6896_s12 + $0x188] sm:$0xff] }
 0x275   : > { %5095 = vmatpush3.bf16.msra.mxu0 %v5092_v35  ;;  %v5188_v35 = vpack.c.bf16 %v3708_v31, %v3707_v34  ;;  %v3017_v34 = vld [vmem:[%s6896_s12 + $0x98] sm:$0xff]  ;;  %v3035_v31 = vld [vmem:[%s6896_s12 + $0x128] sm:$0xff] }
 0x276   : > { %5115 = vmatpush3.bf16.msra.mxu1 %v5112_v36  ;;  %5097 = vmatprep.subr.bf16.mxu0 %v5096_v53  ;;  %v3709_v36 = vld [vmem:[%s6889_s5 + $0x170] sm:$0xff] }
 0x277   : > { %5117 = vmatprep.subr.bf16.mxu1 %v5116_v46 }
 0x279   : > { %5099 = vmatpush3.bf16.msra.mxu0 %v5096_v53  ;;  %v5192_v53 = vpack.c.bf16 %v3710_v52, %v3709_v36  ;;  %v3018_v36 = vld [vmem:[%s6896_s12 + $0xa0] sm:$0xff]  ;;  %v3019_v52 = vld [vmem:[%s6896_s12 + $0xa8] sm:$0xff] }
 0x27a   : > { %5119 = vmatpush3.bf16.msra.mxu1 %v5116_v46  ;;  %5101 = vmatprep.subr.bf16.mxu0 %v5100_v43  ;;  %v3711_v46 = vld [vmem:[%s6889_s5 + $0x180] sm:$0xff] }
 0x27b   : > { %5121 = vmatprep.subr.bf16.mxu1 %v5120_v44 }
 0x27d   : > { %5103 = vmatpush3.bf16.msra.mxu0 %v5100_v43  ;;  %v3713_v43 = vld [vmem:[%s6889_s5 + $0x190] sm:$0xff] }
 0x27e   : > { %5123 = vmatpush3.bf16.msra.mxu1 %v5120_v44  ;;  %5105 = vmatprep.subr.bf16.mxu0 %v5104_v55  ;;  %v3714_v44 = vld [vmem:[%s6889_s5 + $0x198] sm:$0xff] }
 0x27f   : > { %5125 = vmatprep.subr.bf16.mxu1 %v5124_v61  ;;  %v5200_v45 = vpack.c.bf16 %v3714_v44, %v3713_v43  ;;  %v3004_v43 = vld [vmem:[%s6896_s12 + $0x30] sm:$0xff]  ;;  %v3005_v44 = vld [vmem:[%s6896_s12 + $0x38] sm:$0xff] }
 0x281   : > { %5107 = vmatpush3.bf16.msra.mxu0 %v5104_v55  ;;  %v3716_v55 = vld [vmem:[%s6889_s5 + $0x1a8] sm:$0xff] }
 0x282   : > { %5127 = vmatpush3.bf16.msra.mxu1 %v5124_v61  ;;  %4546 = vmatprep.subr.msk.mxu0 %vm1451_vm3, %v3647_v62  ;;  %v5184_v61 = vpack.c.bf16 %v3702_v50, %v3701_v48  ;;  %v3023_v48 = vld [vmem:[%s6896_s12 + $0xc8] sm:$0xff]  ;;  %v3038_v50 = vld [vmem:[%s6896_s12 + $0x140] sm:$0xff] }
 0x283   : > { %4571 = vmatprep.subr.msk.mxu1 %vm1451_vm3, %v3661_v63 }
 0x285   : > { %4547 = vmatpush3.msk.msra.mxu0 %vm1451_vm3, %v3647_v62  ;;  %v5204_v62 = vpack.c.bf16 %v3716_v55, %v3715_v54  ;;  %v3039_v54 = vld [vmem:[%s6896_s12 + $0x148] sm:$0xff]  ;;  %v5230_v55 = vpack.c.bf16 %v3005_v44, %v3004_v43  ;;  %v3195_v43 = vld [vmem:[%s6898_s14 + $0x10] sm:$0xff]  ;;  %v3196_v44 = vld [vmem:[%s6898_s14 + $0x18] sm:$0xff] }
 0x286   : > { %4572 = vmatpush3.msk.msra.mxu1 %vm1451_vm3, %v3661_v63  ;;  %4549 = vmatmul.mubr.msk.f32.vlgmr.msra.gmra.mrb[6].mxu0 %vm1896_vm8, %v6235_v56  ;;  %v3703_v63 = vld [vmem:[%s6888_s4 + $0x1b0] sm:$0xf] }
 0x287   : > { %4574 = vmatmul.mubr.msk.f32.vlgmr.msra.gmra.mrb[6].mxu1 %vm1896_vm8, %v6235_v56  ;;  %5129 = vmatprep.subr.bf16.mxu0 %v5128_v2  ;;  %v5156_v56 = vpack.c.bf16 %v3684_v15, %v3683_v14 }
 0x288   : > { %5149 = vmatprep.subr.bf16.mxu1 %v5148_v7  ;;  %5131 = vmatpush3.bf16.msra.mxu0 %v5128_v2 }
 0x289   : > { %4598 = vmatprep.mubr.msk.f32.mxu0 %vm1896_vm8, %v6259_v4  ;;  %5151 = vmatpush3.bf16.msra.mxu1 %v5148_v7 }
 0x28a   : > { %4623 = vmatprep.mubr.msk.f32.mxu1 %vm1896_vm8, %v6259_v4  ;;  %5133 = vmatprep.subr.bf16.mxu0 %v5132_v10  ;;  %v5140_v4 = vpack.c.bf16 %v3672_v18, %v3671_v17  ;;  %v2819_v17 = vld [vmem:[%s6893_s9] sm:$0x1f] }
 0x28b   : > { %5153 = vmatprep.subr.bf16.mxu1 %v5152_v13  ;;  %v2898_v18 = vld [vmem:[%s6894_s10] sm:$0x1f] }
 0x28c   : > { %5135 = vmatpush3.bf16.msra.mxu0 %v5132_v10 }
 0x28d   : > { %5155 = vmatpush3.bf16.msra.mxu1 %v5152_v13  ;;  %5137 = vmatprep.subr.bf16.mxu0 %v5136_v16 }
 0x28e   : > { %5157 = vmatprep.subr.bf16.mxu1 %v5156_v56 }
 0x290   : > { %5139 = vmatpush3.bf16.msra.mxu0 %v5136_v16 }
 0x291   : > { %5159 = vmatpush3.bf16.msra.mxu1 %v5156_v56  ;;  %5141 = vmatprep.subr.bf16.mxu0 %v5140_v4 }
 0x292   : > { %5161 = vmatprep.subr.bf16.mxu1 %v5160_v21 }
 0x294   : > { %5143 = vmatpush3.bf16.msra.mxu0 %v5140_v4  ;;  %v3032_v4 = vld [vmem:[%s6896_s12 + $0x110] sm:$0xff] }
 0x295   : > { %5163 = vmatpush3.bf16.msra.mxu1 %v5160_v21  ;;  %5145 = vmatprep.subr.bf16.mxu0 %v5144_v27  ;;  %v5249_v21 = vpack.c.bf16 %v3031_v20, %v3030_v19  ;;  %v3010_v20 = vld [vmem:[%s6896_s12 + $0x60] sm:$0xff] }
 0x296   : > { %5165 = vmatprep.subr.bf16.mxu1 %v5164_v59 }
 0x298   : > { %5147 = vmatpush3.bf16.msra.mxu0 %v5144_v27  ;;  %v2998_v27 = vld [vmem:[%s6896_s12] sm:$0xff] }
 0x299   : > { %5167 = vmatpush3.bf16.msra.mxu1 %v5164_v59  ;;  %4596 = vmatprep.subr.msk.mxu0 %vm1451_vm3, %v3675_v49  ;;  %v2999_v59 = vld [vmem:[%s6896_s12 + $0x8] sm:$0xff] }
 0x29a   : > { %4621 = vmatprep.subr.msk.mxu1 %vm1451_vm3, %v3689_v28 }
 0x29c   : > { %4597 = vmatpush3.msk.msra.mxu0 %vm1451_vm3, %v3675_v49  ;;  %v5252_v49 = vpack.c.bf16 %v3033_v47, %v3032_v4  ;;  %v3011_v4 = vld [vmem:[%s6896_s12 + $0x68] sm:$0xff]  ;;  %v3046_v47 = vld [vmem:[%s6896_s12 + $0x180] sm:$0xff] }
 0x29d   : > { %4622 = vmatpush3.msk.msra.mxu1 %vm1451_vm3, %v3689_v28  ;;  %4599 = vmatmul.mubr.msk.f32.vlgmr.msra.gmra.mrb[6].mxu0 %vm1896_vm8, %v6238_v57  ;;  %v5218_v28 = vpack.c.bf16 %v2999_v59, %v2998_v27  ;;  %v3029_v27 = vld [vmem:[%s6896_s12 + $0xf8] sm:$0xff] }
 0x29e   : > { %4624 = vmatmul.mubr.msk.f32.vlgmr.msra.gmra.mrb[6].mxu1 %vm1896_vm8, %v6238_v57  ;;  %5169 = vmatprep.subr.bf16.mxu0 %v5168_v32  ;;  %v5196_v57 = vpack.c.bf16 %v3712_v38, %v3711_v46  ;;  %v3020_v46 = vld [vmem:[%s6896_s12 + $0xb0] sm:$0xff]  ;;  %v3021_v38 = vld [vmem:[%s6896_s12 + $0xb8] sm:$0xff]  ;;  %v5244_v59 = vpack.c.bf16 %v3029_v27, %v3028_v25 }
 0x29f   : > { %5189 = vmatprep.subr.bf16.mxu1 %v5188_v35  ;;  %5171 = vmatpush3.bf16.msra.mxu0 %v5168_v32  ;;  %v5220_v32 = vpack.c.bf16 %v3017_v34, %v3016_v30 }
 0x2a0   : > { %4648 = vmatprep.mubr.msk.f32.mxu0 %vm1896_vm8, %v6263_v5  ;;  %5191 = vmatpush3.bf16.msra.mxu1 %v5188_v35  ;;  %v5222_v35 = vpack.c.bf16 %v3001_v33, %v3000_v51 }
 0x2a1   : > { %4673 = vmatprep.mubr.msk.f32.mxu1 %vm1896_vm8, %v6263_v5  ;;  %5173 = vmatprep.subr.bf16.mxu0 %v5172_v60  ;;  %v5180_v5 = vpack.c.bf16 %v3700_v41, %v3699_v40  ;;  %v5226_v40 = vpack.c.bf16 %v3003_v23, %v3002_v37  ;;  %v5228_v41 = vpack.c.bf16 %v3021_v38, %v3020_v46  ;;  %v3193_v23 = vld [vmem:[%s6898_s14] sm:$0xff] }
 0x2a2   : > { %5193 = vmatprep.subr.bf16.mxu1 %v5192_v53 }
 0x2a3   : > { %5175 = vmatpush3.bf16.msra.mxu0 %v5172_v60  ;;  %v5224_v60 = vpack.c.bf16 %v3019_v52, %v3018_v36 }
 0x2a4   : > { %5195 = vmatpush3.bf16.msra.mxu1 %v5192_v53  ;;  %5177 = vmatprep.subr.bf16.mxu0 %v5176_v39  ;;  %v5255_v53 = vpack.c.bf16 %v3035_v31, %v3034_v29 }
 0x2a5   : > { %5197 = vmatprep.subr.bf16.mxu1 %v5196_v57 }
 0x2a7   : > { %5179 = vmatpush3.bf16.msra.mxu0 %v5176_v39  ;;  %v3036_v39 = vld [vmem:[%s6896_s12 + $0x130] sm:$0xff] }
 0x2a8   : > { %5199 = vmatpush3.bf16.msra.mxu1 %v5196_v57  ;;  %5181 = vmatprep.subr.bf16.mxu0 %v5180_v5  ;;  %v3037_v57 = vld [vmem:[%s6896_s12 + $0x138] sm:$0xff] }
 0x2a9   : > { %5201 = vmatprep.subr.bf16.mxu1 %v5200_v45 }
 0x2ab   : > { %5183 = vmatpush3.bf16.msra.mxu0 %v5180_v5  ;;  %v5258_v5 = vpack.c.bf16 %v3037_v57, %v3036_v39 }
 0x2ac   : > { %5203 = vmatpush3.bf16.msra.mxu1 %v5200_v45  ;;  %5185 = vmatprep.subr.bf16.mxu0 %v5184_v61  ;;  %v3022_v45 = vld [vmem:[%s6896_s12 + $0xc0] sm:$0xff] }
 0x2ad   : > { %5205 = vmatprep.subr.bf16.mxu1 %v5204_v62 }
 0x2af   : > { %5187 = vmatpush3.bf16.msra.mxu0 %v5184_v61  ;;  %v5232_v61 = vpack.c.bf16 %v3023_v48, %v3022_v45  ;;  %v5279_v45 = vpack.c.bf16 %v3196_v44, %v3195_v43  ;;  %v3197_v48 = vld [vmem:[%s6898_s14 + $0x20] sm:$0xff] }
 0x2b0   : > { %5207 = vmatpush3.bf16.msra.mxu1 %v5204_v62  ;;  %4646 = vmatprep.subr.msk.mxu0 %vm1451_vm3, %v3703_v63  ;;  %v3006_v62 = vld [vmem:[%s6896_s12 + $0x40] sm:$0xff] }
 0x2b1   : > { %4671 = vmatprep.subr.msk.mxu1 %vm1451_vm3, %v3717_v0 }
 0x2b3   : > { %4647 = vmatpush3.msk.msra.mxu0 %vm1451_vm3, %v3703_v63  ;;  %v3007_v63 = vld [vmem:[%s6896_s12 + $0x48] sm:$0xff] }
 0x2b4   : > { %4672 = vmatpush3.msk.msra.mxu1 %vm1451_vm3, %v3717_v0  ;;  %4649 = vmatmul.mubr.msk.f32.vlgmr.msra.gmra.mrb[6].mxu0 %vm1896_vm8, %v6241_v58  ;;  %v5261_v0 = vpack.c.bf16 %v3039_v54, %v3038_v50  ;;  %v3198_v50 = vld [vmem:[%s6898_s14 + $0x28] sm:$0xff] }
 0x2b5   : > { %4674 = vmatmul.mubr.msk.f32.vlgmr.msra.gmra.mrb[6].mxu1 %vm1896_vm8, %v6241_v58  ;;  %5208 = vmatprep.subr.bf16.mxu0 %v5475_v42  ;;  %v5282_v54 = vpack.c.bf16 %v3198_v50, %v3197_v48 }
 0x2b6   : > { %5212 = vmatprep.subr.bf16.mxu1 %v5475_v42  ;;  %4680 = vmatprep.mubr.msk.f32.mxu0 %vm5476_vm9, %v5477_v1 }
 0x2b7   : > { %4687 = vmatprep.mubr.msk.f32.mxu1 %vm5476_vm9, %v5477_v1 }
 0x387   : > { %v4650_v2 = vpop.f32.mrb[6].mxu0 }
 0x388   : > { %v2810_v3 = vadd.f32 %v4650_v2, %v3721_v22  ;;  %v4675_v58 = vpop.f32.mrb[6].mxu1  ;;  %v2699_v6 = vpop.f32.mrb[7].mxu0  ;;  %v3025_v2 = vld [vmem:[%s6896_s12 + $0xd8] sm:$0xff] }
 0x389   : > { %v2814_v7 = vadd.f32 %v4675_v58, %v3721_v22  ;;  %v2809_v8 = vadd.f32 %v3721_v22, %v2699_v6  ;;  %v2789_v9 = vpop.f32.mrb[7].mxu1  ;;  %v3041_v58 = vld [vmem:[%s6896_s12 + $0x158] sm:$0xff]  ;;  %v5234_v6 = vpack.c.bf16 %v3007_v63, %v3006_v62  ;;  %v3201_v63 = vld [vmem:[%s6898_s14 + $0x40] sm:$0xff] }
 0x38a   : > { %v2812_v10 = vmax.f32 %v2810_v3, 0.0  ;;  %v2813_v11 = vadd.f32 %v3721_v22, %v2789_v9  ;;  %v3024_v22 = vld [vmem:[%s6896_s12 + $0xd0] sm:$0xff]  ;;  %v3009_v9 = vld [vmem:[%s6896_s12 + $0x58] sm:$0xff] }
 0x38b   : > { %v2816_v12 = vmax.f32 %v2814_v7, 0.0  ;;  %v2811_v13 = vmax.f32 %v2809_v8, 0.0  ;;  %v3040_v3 = vld [vmem:[%s6896_s12 + $0x150] sm:$0xff]  ;;  %v5236_v7 = vpack.c.bf16 %v3025_v2, %v3024_v22 }
 0x38c   : > { %v2815_v14 = vmax.f32 %v2813_v11, 0.0  ;;  %v3008_v8 = vld [vmem:[%s6896_s12 + $0x50] sm:$0xff]  ;;  %v3026_v11 = vld [vmem:[%s6896_s12 + $0xe0] sm:$0xff] }
 0x38d   : > { %v2818_v15 = vmax.f32 %v2812_v10, %v2816_v12  ;;  %v5264_v10 = vpack.c.bf16 %v3041_v58, %v3040_v3  ;;  %v3027_v12 = vld [vmem:[%s6896_s12 + $0xe8] sm:$0xff]  ;;  %v3203_v2 = vld [vmem:[%s6898_s14 + $0x50] sm:$0xff]  ;;  %v3204_v3 = vld [vmem:[%s6898_s14 + $0x58] sm:$0xff] }
 0x38e   : > { %v2817_v16 = vmax.f32 %v2811_v13, %v2815_v14  ;;  %v3042_v13 = vld [vmem:[%s6896_s12 + $0x160] sm:$0xff]  ;;  %v3043_v14 = vld [vmem:[%s6896_s12 + $0x168] sm:$0xff]  ;;  %v5291_v58 = vpack.c.bf16 %v3204_v3, %v3203_v2 }
 0x390   : > { %v5209_v56 = vpack.c.bf16 %v2818_v15, %v2817_v16  ;;  %v5238_v15 = vpack.c.bf16 %v3009_v9, %v3008_v8  ;;  %v5240_v16 = vpack.c.bf16 %v3027_v12, %v3026_v11  ;;  %v3207_v9 = vld [vmem:[%s6898_s14 + $0x70] sm:$0xff]  ;;  %v3285_v11 = vld [vmem:[%s6900_s16 + $0x8] sm:$0xff] }
 0x391   : > { %v3286_v12 = vld [vmem:[%s6900_s16 + $0x10] sm:$0xff] }
 0x392   : > { %5211 = vmatpush3.bf16.msk.msra.mxu0 %vm5210_vm11, %v5209_v56  ;;  %5215 = vmatpush3.bf16.msk.msra.mxu1 %vm5210_vm11, %v5209_v56  ;;  %v5267_v56 = vpack.c.bf16 %v3043_v14, %v3042_v13  ;;  %v3287_v14 = vld [vmem:[%s6900_s16 + $0x18] sm:$0xff] }
 0x393   : > { %5248 = vmatprep.subr.bf16.mxu1 %v5475_v42  ;;  %5217 = vmatprep.subr.bf16.mxu0 %v5216_v26  ;;  %v5273_v26 = vpack.c.bf16 %v3047_v24, %v3046_v47  ;;  %v3048_v24 = vld [vmem:[%s6897_s13] sm:$0x1] }
 0x395   : > { %4681 = vmatmul.mubr.msk.f32.vlgmr.msra.gmra.mrb[8].mxu0 %vm2820_vm12, %v2819_v17  ;;  %4688 = vmatmul.mubr.msk.f32.vlgmr.msra.gmra.mrb[8].mxu1 %vm2820_vm12, %v2898_v18  ;;  %v3044_v17 = vld [vmem:[%s6896_s12 + $0x170] sm:$0xff]  ;;  %v3045_v18 = vld [vmem:[%s6896_s12 + $0x178] sm:$0xff] }
 0x396   : > { %5250 = vmatpush1.bf16.msra.mxu1 %v5249_v21  ;;  %5219 = vmatpush3.bf16.msra.mxu0 %v5218_v28  ;;  %v5270_v19 = vpack.c.bf16 %v3045_v18, %v3044_v17  ;;  %v5242_v21 = vpack.c.bf16 %v3011_v4, %v3010_v20  ;;  %v3013_v28 = vld [vmem:[%s6896_s12 + $0x78] sm:$0xff]  ;;  %v3290_v18 = vld [vmem:[%s6900_s16 + $0x30] sm:$0xff] }
 0x397   : > { %5251 = vmatprep.subr.bf16.mxu1 %v5475_v42  ;;  %5221 = vmatprep.subr.bf16.mxu0 %v5220_v32 }
 0x39a   : > { %5253 = vmatpush1.bf16.msra.mxu1 %v5252_v49  ;;  %5223 = vmatpush3.bf16.msra.mxu0 %v5222_v35  ;;  %v3012_v49 = vld [vmem:[%s6896_s12 + $0x70] sm:$0xff] }
 0x39b   : > { %5254 = vmatprep.subr.bf16.mxu1 %v5475_v42  ;;  %5225 = vmatprep.subr.bf16.mxu0 %v5224_v60  ;;  %v5246_v29 = vpack.c.bf16 %v3013_v28, %v3012_v49  ;;  %v3292_v28 = vld [vmem:[%s6900_s16 + $0x40] sm:$0xff] }
 0x39e   : > { %5256 = vmatpush1.bf16.msra.mxu1 %v5255_v53  ;;  %5227 = vmatpush3.bf16.msra.mxu0 %v5226_v40  ;;  %v3194_v53 = vld [vmem:[%s6898_s14 + $0x8] sm:$0xff] }
 0x39f   : > { %5257 = vmatprep.subr.bf16.mxu1 %v5475_v42  ;;  %5229 = vmatprep.subr.bf16.mxu0 %v5228_v41  ;;  %v5276_v40 = vpack.c.bf16 %v3194_v53, %v3193_v23 }
 0x3a2   : > { %5259 = vmatpush1.bf16.msra.mxu1 %v5258_v5  ;;  %5231 = vmatpush3.bf16.msra.mxu0 %v5230_v55  ;;  %v3199_v55 = vld [vmem:[%s6898_s14 + $0x30] sm:$0xff] }
 0x3a3   : > { %5260 = vmatprep.subr.bf16.mxu1 %v5475_v42  ;;  %5233 = vmatprep.subr.bf16.mxu0 %v5232_v61  ;;  %v3200_v61 = vld [vmem:[%s6898_s14 + $0x38] sm:$0xff] }
 0x3a4   : > { %v5285_v62 = vpack.c.bf16 %v3200_v61, %v3199_v55 }
 0x3a6   : > { %5262 = vmatpush1.bf16.msra.mxu1 %v5261_v0  ;;  %5235 = vmatpush3.bf16.msra.mxu0 %v5234_v6  ;;  %v3202_v0 = vld [vmem:[%s6898_s14 + $0x48] sm:$0xff]  ;;  %v3205_v6 = vld [vmem:[%s6898_s14 + $0x60] sm:$0xff] }
 0x3a7   : > { %5263 = vmatprep.subr.bf16.mxu1 %v5475_v42  ;;  %5237 = vmatprep.subr.bf16.mxu0 %v5236_v7  ;;  %v5288_v22 = vpack.c.bf16 %v3202_v0, %v3201_v63  ;;  %v3206_v7 = vld [vmem:[%s6898_s14 + $0x68] sm:$0xff] }
 0x3a8   : > { %v5294_v8 = vpack.c.bf16 %v3206_v7, %v3205_v6 }
 0x3aa   : > { %5265 = vmatpush1.bf16.msra.mxu1 %v5264_v10  ;;  %5239 = vmatpush3.bf16.msra.mxu0 %v5238_v15  ;;  %v3284_v10 = vld [vmem:[%s6900_s16] sm:$0xff]  ;;  %v5300_v15 = vpack.c.bf16 %v3287_v14, %v3286_v12 }
 0x3ab   : > { %5266 = vmatprep.subr.bf16.mxu1 %v5475_v42  ;;  %5241 = vmatprep.subr.bf16.mxu0 %v5240_v16  ;;  %v5297_v13 = vpack.c.bf16 %v3285_v11, %v3284_v10  ;;  %v3288_v16 = vld [vmem:[%s6900_s16 + $0x20] sm:$0xff] }
 0x3ae   : > { %5268 = vmatpush1.bf16.msra.mxu1 %v5267_v56  ;;  %5243 = vmatpush3.bf16.msra.mxu0 %v5242_v21  ;;  %v3289_v56 = vld [vmem:[%s6900_s16 + $0x28] sm:$0xff] }
 0x3af   : > { %5269 = vmatprep.subr.bf16.mxu1 %v5475_v42  ;;  %5245 = vmatprep.subr.bf16.mxu0 %v5244_v59  ;;  %v5303_v17 = vpack.c.bf16 %v3289_v56, %v3288_v16 }
 0x3b2   : > { %5271 = vmatpush1.bf16.msra.mxu1 %v5270_v19  ;;  %5247 = vmatpush3.bf16.msra.mxu0 %v5246_v29  ;;  %v3291_v19 = vld [vmem:[%s6900_s16 + $0x38] sm:$0xff] }
 0x3b3   : > { %5272 = vmatprep.subr.bf16.mxu1 %v5475_v42  ;;  %5275 = vmatprep.subr.bf16.mxu0 %v5475_v42  ;;  %v5306_v20 = vpack.c.bf16 %v3291_v19, %v3290_v18 }
 0x3b6   : > { %5274 = vmatpush1.bf16.msra.mxu1 %v5273_v26 }
 0x3b7   : > { %5296 = vmatprep.subr.bf16.mxu1 %v5475_v42 }
 0x468   : > { %v2894_v30 = vpop.f32.mrb[8].mxu0  ;;  %v2968_v34 = vpop.f32.mrb[8].mxu1 }
 0x469   : > { %v2972_v31 = vmax.f32 %v2894_v30, %v2968_v34  ;;  %v4682_v32 = vpop.f32.mrb[9].mxu0  ;;  %v4689_v51 = vpop.f32.mrb[9].mxu1  ;;  %v3294_v30 = vld [vmem:[%s6900_s16 + $0x50] sm:$0xf]  ;;  %v3208_v34 = vld [vmem:[%s6899_s15] sm:$0x1] }
 0x46b   : > { %v2982_v33 = vrot.slane %v2972_v31, 3  ;;  %v2974_v35 = vrot.slane %v2972_v31, 1  ;;  %v2986_v36 = vrot.slane %v2972_v31, 4  ;;  %v2978_v52 = vrot.slane %v2972_v31, 2 }
 0x46d   : > { %2983 = vrot.lane.b32.xlu1 %v2982_v33, %s5478_s28  ;;  %2975 = vrot.lane.b32.xlu0 %v2974_v35, %s5479_s18  ;;  %s568_s28 = scalar_lea.vmem [#allocation2], %s567_s24 }
 0x46e   : > { %s3399_s18 = sshll.u32 %s568_s28, 4  ;;  %s6843_s18 = int_to_ptr.vmem [resolvable:$true] %s3399_s18 }
 0x46f   : > { %s5410_s2 = scalar_lea.vmem %s6843_s18, 16  ;;  %p5417_p0 = scmp.lt.s32.totalorder %s6843_s18, %s5415_s26 }
 0x470   : > { %p5411_p11 = scmp.ne.s32.totalorder %s6843_s18, %s5410_s2  ;;  %p5418_p1 = scmp.lt.s32.totalorder %s5416_s29, %s5410_s2 }
 0x471   : > { %2987 = vrot.lane.b32.xlu1 %v2986_v36, %s5480_s22  ;;  %2979 = vrot.lane.b32.xlu0 %v2978_v52, %s5481_s1 }
 0x472   : > { %p5412_p12 = pnand %p5411_p11, %p5616_p5  ;;  %p5419_p2 = por %p5418_p1, %p5417_p0 }
 0x474   : > { %p5413_p13 = pneg %p5412_p12 }
 0x476   : > { %p5420_p3 = pnand %p5419_p2, %p5413_p13 }
 0x4df   : > { %v2984_v60 = vpop.permute.xlu1 %2983  ;;  %v2976_v37 = vpop.permute.xlu0 %2975 }
 0x4e0   : > { %v2991_v5 = vsel %vm2990_vm1, %v2972_v31, %v2976_v37 }
 0x4e3   : > { %v2988_v46 = vpop.permute.xlu1 %2987  ;;  %v2980_v38 = vpop.permute.xlu0 %2979 }
 0x4e4   : > { %v2997_v39 = vsel %vm2996_vm13, %v2984_v60, %v2988_v46  ;;  %v2993_v57 = vsel %vm2992_vm14, %v2976_v37, %v2980_v38  ;;  %3726 = vmatprep.mubr.msk.f32.mxu1 %vm3049_vm15, %v2988_v46 }
 0x4e5   : > { %3187 = vmatmul.mubr.f32.vlgmr.msra.gmra.mrb[10].mxu1 %v2997_v39  ;;  %v2995_v41 = vsel %vm2994_vm0, %v2993_v57, %v2984_v60 }
 0x4e6   : > { %3116 = vmatprep.mubr.f32.mxu0 %v2995_v41  ;;  %4745 = vmatprep.mubr.msk.f32.mxu1 %vm5476_vm9, %v5477_v1 }
 0x4e7   : > { %3117 = vmatmul.mubr.f32.vlgmr.msra.gmra.mrb[10].mxu0 %v2991_v5  ;;  %5298 = vmatpush3.bf16.msra.mxu1 %v5297_v13 }
 0x4e8   : > { %5277 = vmatpush3.bf16.msra.mxu0 %v5276_v40  ;;  %4720 = vmatprep.mubr.msk.f32.mxu0 %vm5476_vm9, %v5477_v1 }
 0x4e9   : > { %5278 = vmatprep.subr.bf16.mxu0 %v5475_v42  ;;  %5299 = vmatprep.subr.bf16.mxu1 %v5475_v42 }
 0x4eb   : > { %5301 = vmatpush3.bf16.msra.mxu1 %v5300_v15 }
 0x4ec   : > { %5280 = vmatpush3.bf16.msra.mxu0 %v5279_v45  ;;  %5302 = vmatprep.subr.bf16.mxu1 %v5475_v42 }
 0x4ed   : > { %5281 = vmatprep.subr.bf16.mxu0 %v5475_v42 }
 0x4ef   : > { %5304 = vmatpush3.bf16.msra.mxu1 %v5303_v17 }
 0x4f0   : > { %5283 = vmatpush3.bf16.msra.mxu0 %v5282_v54  ;;  %5305 = vmatprep.subr.bf16.mxu1 %v5475_v42 }
 0x4f1   : > { %5284 = vmatprep.subr.bf16.mxu0 %v5475_v42 }
 0x4f3   : > { %5307 = vmatpush3.bf16.msra.mxu1 %v5306_v20 }
 0x4f4   : > { %5286 = vmatpush3.bf16.msra.mxu0 %v5285_v62  ;;  %5308 = vmatprep.subr.bf16.mxu1 %v5475_v42 }
 0x4f5   : > { %5287 = vmatprep.subr.bf16.mxu0 %v5475_v42 }
 0x4f8   : > { %5289 = vmatpush3.bf16.msra.mxu0 %v5288_v22 }
 0x4f9   : > { %5290 = vmatprep.subr.bf16.mxu0 %v5475_v42 }
 0x4fc   : > { %5292 = vmatpush3.bf16.msra.mxu0 %v5291_v58 }
 0x4fd   : > { %5293 = vmatprep.subr.bf16.mxu0 %v5475_v42  ;;  %v3293_v42 = vld [vmem:[%s6900_s16 + $0x48] sm:$0xff] }
 0x4fe   : > { %v5309_v29 = vpack.c.bf16 %v3293_v42, %v3292_v28 }
 0x500   : > { %5295 = vmatpush3.bf16.msra.mxu0 %v5294_v8  ;;  %5310 = vmatpush3.bf16.msra.mxu1 %v5309_v29 }
 0x501   : > { %4718 = vmatprep.subr.mxu0 %v5477_v1  ;;  %4743 = vmatprep.subr.mxu1 %v5477_v1  ;;  %v3295_v1 = vld [vmem:[%s6901_s17] sm:$0x1] }
 0x504   : > { %4719 = vmatpush3.msra.mxu0 %v3207_v9  ;;  %4744 = vmatpush3.msk.msra.mxu1 %vm1451_vm3, %v3294_v30 }
 0x5b8   : > { %v3188_v4 = vpop.f32.mrb[10].mxu1 }
 0x5b9   : > { %v3190_v21 = vpop.f32.mrb[11].mxu1 }
 0x5ba   : > { %v4073_v47 = vpop.f32.mrb[10].mxu0 }
 0x5bb   : > { %v4074_v25 = vpop.f32.mrb[11].mxu0 }
 0x5bc   : > { %v4075_v26 = vadd.f32 %v4074_v25, %v4073_v47 }
 0x5be   : > { %v3119_v27 = vadd.f32 %v4075_v26, %v3048_v24 }
 0x5c0   : > { %v3189_v59 = vadd.f32 %v3188_v4, %v3119_v27 }
 0x5c2   : > { %v3192_v49 = vmax.f32 %v3189_v59, 0.0 }
 0x5c4   : > { %4721 = vmatmul.mubr.msk.f32.vlgmr.msra.gmra.mrb[12].mxu0 %vm3209_vm2, %v3192_v49 }
 0x697   : > { %v3279_v31 = vpop.f32.mrb[12].mxu0 }
 0x698   : > { %v3280_v32 = vadd.f32 %v3279_v31, %v3208_v34  ;;  %v4722_v51 = vpop.f32.mrb[13].mxu0 }
 0x69a   : > { %v3283_v33 = vmax.f32 %v3280_v32, 0.0 }
 0x69c   : > { %4746 = vmatmul.mubr.msk.f32.vlgmr.msra.gmra.mrb[12].mxu1 %vm1896_vm8, %v3283_v33 }
 0x76f   : > { %v3368_v35 = vpop.f32.mrb[12].mxu1 }
 0x770   : > { %v3369_v36 = vadd.f32 %v3368_v35, %v3295_v1  ;;  %v4747_v52 = vpop.f32.mrb[13].mxu1 }
 0x772   : > { %v3373_v60 = vsel %vm3372_vm4, %v3369_v36, -inf }
 0x773   : > { %3374 = vmax.xlane.f32.xlu0 %v3373_v60 }
 0x800   : > { %v3375_v37 = vpop.xlane.xlu0 %3374 }
 0x801   : > { %v3376_v23 = vsub.f32 %v3369_v36, %v3375_v37 }
 0x803   : > { %v3377_v53 = vmul.f32 1.442695, %v3376_v23 }
 0x805   : > { %5406 = vpow2.f32 %v3377_v53 }
 0x80f   : > { %v5407_v46 = vpop.eup %5406 }
 0x810   : > { %v3379_v38 = vsel %vm3372_vm4, %v5407_v46, 0.0 }
 0x811   : > { %3380 = vadd.xlane.f32.xlu1 %v3379_v38 }
 0x89e   : > { %v3381_v39 = vpop.xlane.xlu1 %3380 }
 0x89f   : > { %5408 = vlog2.f32 %v3381_v39 }
 0x8a9   : > { %v5409_v57 = vpop.eup %5408 }
 0x8aa   : > { %v3383_v40 = vmul.f32 0.6931472, %v5409_v57 }
 0x8ac   : > { %v3384_v41 = vsub.f32 %v3376_v23, %v3383_v40 }
 0x8ae   : > { %3385 = vst.msk [vmem:[%s568_s28] sm:$0x1] %vm3372_vm4, %v3384_v41 }
 0x8af   : > { %5423 = shalt.err (!%p5420_p3)
}
 0x8b0   : > { %s5424_s24 = scalar_lea.hbm %s6841_s11, 16  ;;  %s5428_s22 = scalar_lea.hbm %s6931_s20, 32 }
 0x8b1   : > { %p5425_p4 = scmp.ne.s32.totalorder %s6841_s11, %s5424_s24  ;;  %p5429_p9 = scmp.lt.u32.totalorder %s6841_s11, %s6931_s20 }
 0x8b2   : > { %p5430_p10 = scmp.lt.u32.totalorder %s5428_s22, %s5424_s24  ;;  %p5432_p12 = scmp.lt.u32.totalorder %s5424_s24, %s6841_s11 }
 0x8b3   : > { %p5426_p7 = pnand %p5425_p4, %p5616_p5 }
 0x8b4   : > { %p5431_p11 = por %p5430_p10, %p5429_p9 }
 0x8b5   : > { %p5427_p8 = pneg %p5426_p7 }
 0x8b6   : > { %p5433_p13 = por %p5432_p12, %p5431_p11 }
 0x8b8   : > { %p5434_p0 = pnand %p5433_p13, %p5427_p8 }
 0x8ba   : > { %5437 = shalt.err (!%p5434_p0)
}
 0x8bb   : > { %5359 = dma.vmem_to_hbm [thread:$0]  (%p5616_p5), %s6843_s18, 16, %s6841_s11, %s3387_s19  }
 0x8bc PF: > { %s6932_s2 = sld [smem:[#allocation7_spill]]  ;;  %s6933_s26 = sld [smem:[#allocation5_spill]] }
 0x8c2   : > { %p5365_p1 = scmp.ge.s32.totalorder %s6932_s2, 2  ;;  %s3411_s0 = sand.u32 1, %s6933_s26  }
 0x8c3   : > { %s3412_s28 = scalar_lea.sflag [#allocation3], %s3411_s0 }
 0x8c4   : > { %p5362_p2 = pnand %p5365_p1, %p5620_p6 }
 0x8c6   : > { %5455 = dma.done.wait (!%p5362_p2), %s3412_s28, 16  }
 0x8c7   : > { %5457 = vsyncadd (!%p5362_p2), %s3412_s28, 4294967280  ;;  %s6935_s29 = sld [smem:[#allocation8_spill]]  ;;  %s6936_s24 = sld [smem:[#allocation6_spill]] }
 0x8c8   : > { %s6937_s28 = sld [smem:[#allocation9_spill]]  ;;  %s6938_s26 = smov %s5464_s27 }
 0x8cd   : > { %p28_p3 = scmp.ge.s32.totalorder %s6935_s29, 4   ;;  %s6939_s27 = smov %s6936_s24 }
 0x8cf   :  { %30 = sbr.rel (!%p28_p3) target bundleno = 8 (0x8), region = 143 }
 0x8d6   :  { %3416 = vsyncpa [#allocation3], 1 }
 0x8d7   :  { %3418 = vsyncpa [#allocation3 + $0x1], 1 }

</bundles_post_ra>
